<compile_context>
chip_gen: v7x
topology: tpu7x:2x2x1
jax: 0.10.0
libtpu: 0.0.40
codegen_flags: <defaults>
</compile_context>

<pallas_src>
import functools

import jax
import jax.numpy as jnp
import numpy as np
from jax import lax
from jax.experimental import pallas as pl
from jax.experimental.pallas import tpu as pltpu


def _relu6(x):
    return jnp.minimum(jnp.maximum(x, 0.0), 6.0)


# ----------------------------------------------------------------------------
# Fused Pallas kernel: expand(1x1) -> depthwise(3x3) -> project(1x1) [+res]
# ----------------------------------------------------------------------------
def _make_fused_kernel(H, W, hidden, stride, expand, use_res):
    Ho = (H + 2 - 3) // stride + 1
    Wo = (W + 2 - 3) // stride + 1

    def kernel(*refs):
        if expand:
            (x_ref, w_exp_ref, b_exp_ref, w_dw_ref, b_dw_ref,
             w_proj_ref, b_proj_ref, o_ref, pad_ref) = refs
        else:
            (x_ref, w_dw_ref, b_dw_ref,
             w_proj_ref, b_proj_ref, o_ref, pad_ref) = refs

        # Input block is channel-major: (Cin, H*W)  (lane axis = H*W, dense).
        x_cm = x_ref[...].astype(jnp.float32)

        # ---- expand 1x1 conv (BN scale folded into weights) + bias + ReLU6 --
        x_nhwc = jnp.transpose(x_cm, (1, 0))                     # (H*W, Cin)
        if expand:
            h = jnp.dot(x_nhwc, w_exp_ref[...],
                        preferred_element_type=jnp.float32)      # (H*W, hidden)
            h = _relu6(h + b_exp_ref[...])
        else:
            h = x_nhwc                                           # hidden == Cin

        # ---- depthwise 3x3 (pad=1, stride=s) + bias + ReLU6 -----------------
        # 1-px halo lives in a VMEM scratch; nothing is padded through HBM.
        pad_ref[...] = jnp.zeros_like(pad_ref)                   # zero halo
        pad_ref[1:H + 1, 1:W + 1, :] = h.reshape(H, W, hidden)   # interior

        acc = None
        for ky in range(3):
            for kx in range(3):
                if stride == 1:
                    patch = pad_ref[ky:ky + Ho, kx:kx + Wo, :]
                else:
                    patch = pad_ref[pl.ds(ky, Ho, stride=stride),
                                    pl.ds(kx, Wo, stride=stride), :]
                k = ky * 3 + kx
                tap = w_dw_ref[k:k + 1, :].reshape(1, 1, hidden)
                term = patch * tap
                acc = term if acc is None else acc + term        # (Ho, Wo, hid)

        acc2d = _relu6(acc.reshape(Ho * Wo, hidden) + b_dw_ref[...])

        # ---- project 1x1 conv (BN scale folded) + bias (+residual) ----------
        # Emit channel-major (oup, Ho*Wo): lane-dense stores, NCHW for free.
        out_t = jnp.einsum("oh,mh->om", w_proj_ref[...], acc2d,
                           preferred_element_type=jnp.float32)   # (oup, Ho*Wo)
        out_t = out_t + b_proj_ref[...]
        if use_res:
            out_t = out_t + x_cm
        o_ref[...] = out_t.astype(o_ref.dtype)

    return kernel


@functools.partial(jax.jit, static_argnames=("stride", "expand_ratio", "inp", "oup"))
def inverted_residual(x_nchw, kparams, *, stride, expand_ratio, inp, oup):
    """InvertedResidual forward. x_nchw: (N, Cin, H, W) like PyTorch."""
    N, C, H, W = x_nchw.shape
    assert C == inp
    hidden = int(round(inp * expand_ratio))
    expand = expand_ratio != 1
    use_res = (stride == 1) and (inp == oup)
    Ho = (H + 2 - 3) // stride + 1
    Wo = (W + 2 - 3) // stride + 1

    # Channel-major, spatially-flattened view (a free reshape of NCHW).
    x_cm = x_nchw.reshape(N, inp, H * W)

    in_specs = [pl.BlockSpec((None, inp, H * W), lambda n: (n, 0, 0))]
    args = [x_cm]
    if expand:
        in_specs += [pl.BlockSpec((inp, hidden), lambda n: (0, 0)),
                     pl.BlockSpec((1, hidden), lambda n: (0, 0))]
        args += [kparams["w_exp"], kparams["b_exp"]]
    in_specs += [pl.BlockSpec((9, hidden), lambda n: (0, 0)),
                 pl.BlockSpec((1, hidden), lambda n: (0, 0)),
                 pl.BlockSpec((oup, hidden), lambda n: (0, 0)),
                 pl.BlockSpec((oup, 1), lambda n: (0, 0))]
    args += [kparams["w_dw"], kparams["b_dw"],
             kparams["w_proj_t"], kparams["b_proj"]]

    kernel = _make_fused_kernel(H, W, hidden, stride, expand, use_res)

    out_cm = pl.pallas_call(
        kernel,
        out_shape=jax.ShapeDtypeStruct((N, oup, Ho * Wo), x_nchw.dtype),
        grid_spec=pltpu.PrefetchScalarGridSpec(
            num_scalar_prefetch=0,
            grid=(N,),
            in_specs=in_specs,
            out_specs=pl.BlockSpec((None, oup, Ho * Wo), lambda n: (n, 0, 0)),
            scratch_shapes=[pltpu.VMEM((H + 2, W + 2, hidden), jnp.float32)],
        ),
        compiler_params=pltpu.CompilerParams(
            dimension_semantics=("parallel",),
        ),
    )(*args)
    return out_cm.reshape(N, oup, Ho, Wo)   # already NCHW: no transpose needed


# ----------------------------------------------------------------------------
# Parameters: raw (PyTorch-like) + kernel-ready folded versions
# ----------------------------------------------------------------------------
def _fold_bn(gamma, beta, mean, var, eps=1e-5):
    scale = gamma / jnp.sqrt(var + eps)
    return scale, beta - mean * scale


def make_params(key, inp, oup, expand_ratio):
    """Raw conv weights + inference-BN (scale, bias) pairs."""
    hidden = int(round(inp * expand_ratio))
    keys = jax.random.split(key, 16)
    p = {}
    if expand_ratio != 1:
        p["w_exp"] = 0.1 * jax.random.normal(keys[0], (inp, hidden), jnp.float32)
        p["s_exp"], p["b_exp"] = _fold_bn(
            jax.random.uniform(keys[1], (hidden,), minval=0.5, maxval=1.5),
            0.1 * jax.random.normal(keys[2], (hidden,)),
            0.1 * jax.random.normal(keys[3], (hidden,)),
            jax.random.uniform(keys[4], (hidden,), minval=0.5, maxval=1.5),
        )
    p["w_dw"] = 0.1 * jax.random.normal(keys[5], (9, hidden), jnp.float32)
    p["s_dw"], p["b_dw"] = _fold_bn(
        jax.random.uniform(keys[6], (hidden,), minval=0.5, maxval=1.5),
        0.1 * jax.random.normal(keys[7], (hidden,)),
        0.1 * jax.random.normal(keys[8], (hidden,)),
        jax.random.uniform(keys[9], (hidden,), minval=0.5, maxval=1.5),
    )
    p["w_proj"] = 0.1 * jax.random.normal(keys[10], (hidden, oup), jnp.float32)
    p["s_proj"], p["b_proj"] = _fold_bn(
        jax.random.uniform(keys[11], (oup,), minval=0.5, maxval=1.5),
        0.1 * jax.random.normal(keys[12], (oup,)),
        0.1 * jax.random.normal(keys[13], (oup,)),
        jax.random.uniform(keys[14], (oup,), minval=0.5, maxval=1.5),
    )
    return p


def prepare_kernel_params(p, expand_ratio):
    """Fold BN scales into conv weights; reshape biases for the fused kernel."""
    kp = {}
    if expand_ratio != 1:
        kp["w_exp"] = (p["w_exp"] * p["s_exp"][None, :]).astype(jnp.float32)
        kp["b_exp"] = p["b_exp"].reshape(1, -1).astype(jnp.float32)
    kp["w_dw"] = (p["w_dw"] * p["s_dw"][None, :]).astype(jnp.float32)
    kp["b_dw"] = p["b_dw"].reshape(1, -1).astype(jnp.float32)
    kp["w_proj_t"] = (p["w_proj"] * p["s_proj"][None, :]).T.astype(jnp.float32)
    kp["b_proj"] = p["b_proj"].reshape(-1, 1).astype(jnp.float32)
    return kp


# ----------------------------------------------------------------------------
# Pure-JAX reference (no Pallas) for correctness checking.
# ----------------------------------------------------------------------------
def reference_inverted_residual(x_nchw, p, *, stride, expand_ratio, inp, oup):
    use_res = (stride == 1) and (inp == oup)
    x = jnp.transpose(x_nchw, (0, 2, 3, 1))
    h = x
    dn = ("NHWC", "HWIO", "NHWC")
    if expand_ratio != 1:
        w = p["w_exp"].reshape(1, 1, inp, -1)
        h = lax.conv_general_dilated(h, w, (1, 1), "VALID", dimension_numbers=dn)
        h = jnp.clip(h * p["s_exp"] + p["b_exp"], 0.0, 6.0)
    hidden = h.shape[-1]
    wdw = p["w_dw"].reshape(3, 3, hidden).reshape(3, 3, 1, hidden)
    h = lax.conv_general_dilated(h, wdw, (stride, stride), ((1, 1), (1, 1)),
                                 dimension_numbers=dn, feature_group_count=hidden)
    h = jnp.clip(h * p["s_dw"] + p["b_dw"], 0.0, 6.0)
    wpr = p["w_proj"].reshape(1, 1, hidden, oup)
    h = lax.conv_general_dilated(h, wpr, (1, 1), "VALID", dimension_numbers=dn)
    h = h * p["s_proj"] + p["b_proj"]
    if use_res:
        h = h + x
    return jnp.transpose(h, (0, 3, 1, 2))


if __name__ == "__main__":
    # InvertedResidual(inp=8, oup=8, stride=1, expand_ratio=6) -> residual path.
    INP, OUP, STRIDE, EXPAND = 8, 8, 1, 6
    N, H, W = 2, 16, 16

    key = jax.random.PRNGKey(0)
    kx_, kp_ = jax.random.split(key)
    x = jax.random.normal(kx_, (N, INP, H, W), jnp.float32)   # NCHW like PyTorch
    raw_params = make_params(kp_, INP, OUP, EXPAND)
    kernel_params = prepare_kernel_params(raw_params, EXPAND)

    out = inverted_residual(x, kernel_params, stride=STRIDE,
                            expand_ratio=EXPAND, inp=INP, oup=OUP)
    out = jax.block_until_ready(out)

    ref = reference_inverted_residual(x, raw_params, stride=STRIDE,
                                      expand_ratio=EXPAND, inp=INP, oup=OUP)
    np.testing.assert_allclose(np.asarray(out), np.asarray(ref),
                               rtol=2e-4, atol=2e-4)
    assert out.shape == (N, OUP, H, W)
    print("KERNEL_OK")
</pallas_src>

<mosaic_0001>
module attributes {stable_mosaic.version = 11 : i64} {
  func.func @kernel(%arg0: i32, %arg1: memref<1x8x256xf32, #tpu.memory_space<vmem>>, %arg2: memref<8x48xf32, #tpu.memory_space<vmem>>, %arg3: memref<1x48xf32, #tpu.memory_space<vmem>>, %arg4: memref<9x48xf32, #tpu.memory_space<vmem>>, %arg5: memref<1x48xf32, #tpu.memory_space<vmem>>, %arg6: memref<8x48xf32, #tpu.memory_space<vmem>>, %arg7: memref<8x1xf32, #tpu.memory_space<vmem>>, %arg8: memref<1x8x256xf32, #tpu.memory_space<vmem>>, %arg9: memref<18x18x48xf32, #tpu.memory_space<vmem>>) attributes {dimension_semantics = [#tpu.dimension_semantics<parallel>], iteration_bounds = array<i64: 2>, scalar_prefetch = 0 : i64, scratch_operands = 1 : i64, tpu.core_type = #tpu.core_type<tc>, window_params = [{transform_indices = @transform_0, window_bounds = array<i64: 1, 8, 256>}, {pipeline_mode = #tpu.pipeline_mode<synchronous>, transform_indices = @transform_1, window_bounds = array<i64: 8, 48>}, {pipeline_mode = #tpu.pipeline_mode<synchronous>, transform_indices = @transform_2, window_bounds = array<i64: 1, 48>}, {pipeline_mode = #tpu.pipeline_mode<synchronous>, transform_indices = @transform_3, window_bounds = array<i64: 9, 48>}, {pipeline_mode = #tpu.pipeline_mode<synchronous>, transform_indices = @transform_4, window_bounds = array<i64: 1, 48>}, {pipeline_mode = #tpu.pipeline_mode<synchronous>, transform_indices = @transform_5, window_bounds = array<i64: 8, 48>}, {pipeline_mode = #tpu.pipeline_mode<synchronous>, transform_indices = @transform_6, window_bounds = array<i64: 8, 1>}, {transform_indices = @transform_7, window_bounds = array<i64: 1, 8, 256>}]} {
    %c0 = arith.constant 0 : index
    %c0_0 = arith.constant 0 : index
    %c0_1 = arith.constant 0 : index
    %0 = vector.load %arg1[%c0, %c0_0, %c0_1] : memref<1x8x256xf32, #tpu.memory_space<vmem>>, vector<1x8x256xf32>
    %1 = vector.shape_cast %0 : vector<1x8x256xf32> to vector<8x256xf32>
    %2 = tpu.transpose %1, [1, 0] : vector<8x256xf32> -> vector<256x8xf32>
    %c0_2 = arith.constant 0 : index
    %c0_3 = arith.constant 0 : index
    %3 = vector.load %arg2[%c0_2, %c0_3] : memref<8x48xf32, #tpu.memory_space<vmem>>, vector<8x48xf32>
    %cst = arith.constant dense<0.000000e+00> : vector<256x48xf32>
    %4 = tpu.matmul %2, %3, %cst {dimension_numbers = #tpu.dot_dimension_numbers<[1], [0], [0], [1], [0, 0, 1, 1], [], []>} : vector<256x8xf32>, vector<8x48xf32>, vector<256x48xf32> -> vector<256x48xf32>
    %c0_4 = arith.constant 0 : index
    %c0_5 = arith.constant 0 : index
    %5 = vector.load %arg3[%c0_4, %c0_5] : memref<1x48xf32, #tpu.memory_space<vmem>>, vector<1x48xf32>
    %6 = vector.broadcast %5 : vector<1x48xf32> to vector<256x48xf32>
    %7 = arith.addf %4, %6 : vector<256x48xf32>
    %cst_6 = arith.constant 0.000000e+00 : f32
    %8 = vector.broadcast %cst_6 : f32 to vector<256x48xf32>
    %9 = arith.maximumf %7, %8 : vector<256x48xf32>
    %cst_7 = arith.constant 6.000000e+00 : f32
    %10 = vector.broadcast %cst_7 : f32 to vector<256x48xf32>
    %11 = arith.minimumf %9, %10 : vector<256x48xf32>
    %cst_8 = arith.constant 0.000000e+00 : f32
    %12 = vector.broadcast %cst_8 : f32 to vector<18x18x48xf32>
    %c0_9 = arith.constant 0 : index
    %c0_10 = arith.constant 0 : index
    %c0_11 = arith.constant 0 : index
    %13 = vector.load %arg9[%c0_9, %c0_10, %c0_11] : memref<18x18x48xf32, #tpu.memory_space<vmem>>, vector<18x18x48xf32>
    tpu.vector_store %arg9[%c0_9, %c0_10, %c0_11], %12 {strides = array<i32>} : memref<18x18x48xf32, #tpu.memory_space<vmem>>, vector<18x18x48xf32>,
    %14 = vector.shape_cast %11 : vector<256x48xf32> to vector<16x16x48xf32>
    %c1 = arith.constant 1 : index
    %c1_12 = arith.constant 1 : index
    %c0_13 = arith.constant 0 : index
    %15 = vector.load %arg9[%c1, %c1_12, %c0_13] : memref<18x18x48xf32, #tpu.memory_space<vmem>>, vector<16x16x48xf32>
    tpu.vector_store %arg9[%c1, %c1_12, %c0_13], %14 {strides = array<i32>} : memref<18x18x48xf32, #tpu.memory_space<vmem>>, vector<16x16x48xf32>,
    %c0_14 = arith.constant 0 : index
    %c0_15 = arith.constant 0 : index
    %c0_16 = arith.constant 0 : index
    %16 = vector.load %arg9[%c0_14, %c0_15, %c0_16] : memref<18x18x48xf32, #tpu.memory_space<vmem>>, vector<16x16x48xf32>
    %c0_17 = arith.constant 0 : index
    %c0_18 = arith.constant 0 : index
    %17 = vector.load %arg4[%c0_17, %c0_18] : memref<9x48xf32, #tpu.memory_space<vmem>>, vector<1x48xf32>
    %18 = vector.shape_cast %17 : vector<1x48xf32> to vector<1x1x48xf32>
    %19 = vector.broadcast %18 : vector<1x1x48xf32> to vector<16x16x48xf32>
    %20 = arith.mulf %16, %19 : vector<16x16x48xf32>
    %c0_19 = arith.constant 0 : index
    %c1_20 = arith.constant 1 : index
    %c0_21 = arith.constant 0 : index
    %21 = vector.load %arg9[%c0_19, %c1_20, %c0_21] : memref<18x18x48xf32, #tpu.memory_space<vmem>>, vector<16x16x48xf32>
    %c1_22 = arith.constant 1 : index
    %c0_23 = arith.constant 0 : index
    %22 = vector.load %arg4[%c1_22, %c0_23] : memref<9x48xf32, #tpu.memory_space<vmem>>, vector<1x48xf32>
    %23 = vector.shape_cast %22 : vector<1x48xf32> to vector<1x1x48xf32>
    %24 = vector.broadcast %23 : vector<1x1x48xf32> to vector<16x16x48xf32>
    %25 = arith.mulf %21, %24 : vector<16x16x48xf32>
    %26 = arith.addf %20, %25 : vector<16x16x48xf32>
    %c0_24 = arith.constant 0 : index
    %c2 = arith.constant 2 : index
    %c0_25 = arith.constant 0 : index
    %27 = vector.load %arg9[%c0_24, %c2, %c0_25] : memref<18x18x48xf32, #tpu.memory_space<vmem>>, vector<16x16x48xf32>
    %c2_26 = arith.constant 2 : index
    %c0_27 = arith.constant 0 : index
    %28 = vector.load %arg4[%c2_26, %c0_27] : memref<9x48xf32, #tpu.memory_space<vmem>>, vector<1x48xf32>
    %29 = vector.shape_cast %28 : vector<1x48xf32> to vector<1x1x48xf32>
    %30 = vector.broadcast %29 : vector<1x1x48xf32> to vector<16x16x48xf32>
    %31 = arith.mulf %27, %30 : vector<16x16x48xf32>
    %32 = arith.addf %26, %31 : vector<16x16x48xf32>
    %c1_28 = arith.constant 1 : index
    %c0_29 = arith.constant 0 : index
    %c0_30 = arith.constant 0 : index
    %33 = vector.load %arg9[%c1_28, %c0_29, %c0_30] : memref<18x18x48xf32, #tpu.memory_space<vmem>>, vector<16x16x48xf32>
    %c3 = arith.constant 3 : index
    %c0_31 = arith.constant 0 : index
    %34 = vector.load %arg4[%c3, %c0_31] : memref<9x48xf32, #tpu.memory_space<vmem>>, vector<1x48xf32>
    %35 = vector.shape_cast %34 : vector<1x48xf32> to vector<1x1x48xf32>
    %36 = vector.broadcast %35 : vector<1x1x48xf32> to vector<16x16x48xf32>
    %37 = arith.mulf %33, %36 : vector<16x16x48xf32>
    %38 = arith.addf %32, %37 : vector<16x16x48xf32>
    %c1_32 = arith.constant 1 : index
    %c1_33 = arith.constant 1 : index
    %c0_34 = arith.constant 0 : index
    %39 = vector.load %arg9[%c1_32, %c1_33, %c0_34] : memref<18x18x48xf32, #tpu.memory_space<vmem>>, vector<16x16x48xf32>
    %c4 = arith.constant 4 : index
    %c0_35 = arith.constant 0 : index
    %40 = vector.load %arg4[%c4, %c0_35] : memref<9x48xf32, #tpu.memory_space<vmem>>, vector<1x48xf32>
    %41 = vector.shape_cast %40 : vector<1x48xf32> to vector<1x1x48xf32>
    %42 = vector.broadcast %41 : vector<1x1x48xf32> to vector<16x16x48xf32>
    %43 = arith.mulf %39, %42 : vector<16x16x48xf32>
    %44 = arith.addf %38, %43 : vector<16x16x48xf32>
    %c1_36 = arith.constant 1 : index
    %c2_37 = arith.constant 2 : index
    %c0_38 = arith.constant 0 : index
    %45 = vector.load %arg9[%c1_36, %c2_37, %c0_38] : memref<18x18x48xf32, #tpu.memory_space<vmem>>, vector<16x16x48xf32>
    %c5 = arith.constant 5 : index
    %c0_39 = arith.constant 0 : index
    %46 = vector.load %arg4[%c5, %c0_39] : memref<9x48xf32, #tpu.memory_space<vmem>>, vector<1x48xf32>
    %47 = vector.shape_cast %46 : vector<1x48xf32> to vector<1x1x48xf32>
    %48 = vector.broadcast %47 : vector<1x1x48xf32> to vector<16x16x48xf32>
    %49 = arith.mulf %45, %48 : vector<16x16x48xf32>
    %50 = arith.addf %44, %49 : vector<16x16x48xf32>
    %c2_40 = arith.constant 2 : index
    %c0_41 = arith.constant 0 : index
    %c0_42 = arith.constant 0 : index
    %51 = vector.load %arg9[%c2_40, %c0_41, %c0_42] : memref<18x18x48xf32, #tpu.memory_space<vmem>>, vector<16x16x48xf32>
    %c6 = arith.constant 6 : index
    %c0_43 = arith.constant 0 : index
    %52 = vector.load %arg4[%c6, %c0_43] : memref<9x48xf32, #tpu.memory_space<vmem>>, vector<1x48xf32>
    %53 = vector.shape_cast %52 : vector<1x48xf32> to vector<1x1x48xf32>
    %54 = vector.broadcast %53 : vector<1x1x48xf32> to vector<16x16x48xf32>
    %55 = arith.mulf %51, %54 : vector<16x16x48xf32>
    %56 = arith.addf %50, %55 : vector<16x16x48xf32>
    %c2_44 = arith.constant 2 : index
    %c1_45 = arith.constant 1 : index
    %c0_46 = arith.constant 0 : index
    %57 = vector.load %arg9[%c2_44, %c1_45, %c0_46] : memref<18x18x48xf32, #tpu.memory_space<vmem>>, vector<16x16x48xf32>
    %c7 = arith.constant 7 : index
    %c0_47 = arith.constant 0 : index
    %58 = vector.load %arg4[%c7, %c0_47] : memref<9x48xf32, #tpu.memory_space<vmem>>, vector<1x48xf32>
    %59 = vector.shape_cast %58 : vector<1x48xf32> to vector<1x1x48xf32>
    %60 = vector.broadcast %59 : vector<1x1x48xf32> to vector<16x16x48xf32>
    %61 = arith.mulf %57, %60 : vector<16x16x48xf32>
    %62 = arith.addf %56, %61 : vector<16x16x48xf32>
    %c2_48 = arith.constant 2 : index
    %c2_49 = arith.constant 2 : index
    %c0_50 = arith.constant 0 : index
    %63 = vector.load %arg9[%c2_48, %c2_49, %c0_50] : memref<18x18x48xf32, #tpu.memory_space<vmem>>, vector<16x16x48xf32>
    %c8 = arith.constant 8 : index
    %c0_51 = arith.constant 0 : index
    %64 = vector.load %arg4[%c8, %c0_51] : memref<9x48xf32, #tpu.memory_space<vmem>>, vector<1x48xf32>
    %65 = vector.shape_cast %64 : vector<1x48xf32> to vector<1x1x48xf32>
    %66 = vector.broadcast %65 : vector<1x1x48xf32> to vector<16x16x48xf32>
    %67 = arith.mulf %63, %66 : vector<16x16x48xf32>
    %68 = arith.addf %62, %67 : vector<16x16x48xf32>
    %69 = vector.shape_cast %68 : vector<16x16x48xf32> to vector<256x48xf32>
    %c0_52 = arith.constant 0 : index
    %c0_53 = arith.constant 0 : index
    %70 = vector.load %arg5[%c0_52, %c0_53] : memref<1x48xf32, #tpu.memory_space<vmem>>, vector<1x48xf32>
    %71 = vector.broadcast %70 : vector<1x48xf32> to vector<256x48xf32>
    %72 = arith.addf %69, %71 : vector<256x48xf32>
    %cst_54 = arith.constant 0.000000e+00 : f32
    %73 = vector.broadcast %cst_54 : f32 to vector<256x48xf32>
    %74 = arith.maximumf %72, %73 : vector<256x48xf32>
    %cst_55 = arith.constant 6.000000e+00 : f32
    %75 = vector.broadcast %cst_55 : f32 to vector<256x48xf32>
    %76 = arith.minimumf %74, %75 : vector<256x48xf32>
    %c0_56 = arith.constant 0 : index
    %c0_57 = arith.constant 0 : index
    %77 = vector.load %arg6[%c0_56, %c0_57] : memref<8x48xf32, #tpu.memory_space<vmem>>, vector<8x48xf32>
    "tpu.trace_start"() <{level = 10 : i32, message = "oh,mh->om"}> : () -> ()
    %cst_58 = arith.constant dense<0.000000e+00> : vector<8x256xf32>
    %78 = tpu.matmul %77, %76, %cst_58 {dimension_numbers = #tpu.dot_dimension_numbers<[1], [1], [0], [0], [0, 0, 1, 0], [], []>} : vector<8x48xf32>, vector<256x48xf32>, vector<8x256xf32> -> vector<8x256xf32>
    "tpu.trace_stop"() : () -> ()
    %c0_59 = arith.constant 0 : index
    %c0_60 = arith.constant 0 : index
    %79 = vector.load %arg7[%c0_59, %c0_60] : memref<8x1xf32, #tpu.memory_space<vmem>>, vector<8x1xf32>
    %80 = vector.broadcast %79 : vector<8x1xf32> to vector<8x256xf32>
    %81 = arith.addf %78, %80 : vector<8x256xf32>
    %82 = arith.addf %81, %1 : vector<8x256xf32>
    %c0_61 = arith.constant 0 : index
    %c0_62 = arith.constant 0 : index
    %c0_63 = arith.constant 0 : index
    %83 = vector.load %arg8[%c0_61, %c0_62, %c0_63] : memref<1x8x256xf32, #tpu.memory_space<vmem>>, vector<1x8x256xf32>
    %84 = vector.shape_cast %83 : vector<1x8x256xf32> to vector<8x256xf32>
    %85 = vector.shape_cast %82 : vector<8x256xf32> to vector<1x8x256xf32>
    tpu.vector_store %arg8[%c0_61, %c0_62, %c0_63], %85 {strides = array<i32>} : memref<1x8x256xf32, #tpu.memory_space<vmem>>, vector<1x8x256xf32>,
    return
  }
  func.func @transform_0(%arg0: i32) -> (i32, i32, i32) {
    %c0_i32 = arith.constant 0 : i32
    %c0_i32_0 = arith.constant 0 : i32
    %c0_i32_1 = arith.constant 0 : i32
    return %arg0, %c0_i32, %c0_i32_0 : i32, i32, i32
  }
  func.func @transform_1(%arg0: i32) -> (i32, i32) {
    %c0_i32 = arith.constant 0 : i32
    %c0_i32_0 = arith.constant 0 : i32
    %c0_i32_1 = arith.constant 0 : i32
    return %c0_i32, %c0_i32_0 : i32, i32
  }
  func.func @transform_2(%arg0: i32) -> (i32, i32) {
    %c0_i32 = arith.constant 0 : i32
    %c0_i32_0 = arith.constant 0 : i32
    %c0_i32_1 = arith.constant 0 : i32
    return %c0_i32, %c0_i32_0 : i32, i32
  }
  func.func @transform_3(%arg0: i32) -> (i32, i32) {
    %c0_i32 = arith.constant 0 : i32
    %c0_i32_0 = arith.constant 0 : i32
    %c0_i32_1 = arith.constant 0 : i32
    return %c0_i32, %c0_i32_0 : i32, i32
  }
  func.func @transform_4(%arg0: i32) -> (i32, i32) {
    %c0_i32 = arith.constant 0 : i32
    %c0_i32_0 = arith.constant 0 : i32
    %c0_i32_1 = arith.constant 0 : i32
    return %c0_i32, %c0_i32_0 : i32, i32
  }
  func.func @transform_5(%arg0: i32) -> (i32, i32) {
    %c0_i32 = arith.constant 0 : i32
    %c0_i32_0 = arith.constant 0 : i32
    %c0_i32_1 = arith.constant 0 : i32
    return %c0_i32, %c0_i32_0 : i32, i32
  }
  func.func @transform_6(%arg0: i32) -> (i32, i32) {
    %c0_i32 = arith.constant 0 : i32
    %c0_i32_0 = arith.constant 0 : i32
    %c0_i32_1 = arith.constant 0 : i32
    return %c0_i32, %c0_i32_0 : i32, i32
  }
  func.func @transform_7(%arg0: i32) -> (i32, i32, i32) {
    %c0_i32 = arith.constant 0 : i32
    %c0_i32_0 = arith.constant 0 : i32
    %c0_i32_1 = arith.constant 0 : i32
    return %arg0, %c0_i32, %c0_i32_0 : i32, i32, i32
  }
}

</mosaic_0001>

<bundles_post_ra>
// kernel: inverted_residual.1
= control target key start
LH: loop header
LB: loop body
LE: loop exit
PB: predicated region body
PF: predicated region fallthrough
CT: control target
= control target key end

     0   :  { %s2375_s24 = smov 0   ;;  %s3468_s0 = inlined_call_operand.vmem [shape: f32[2,8,256], index: 0, kind: input, shape index: {}]   ;;  %s3469_s1 = inlined_call_operand.vmem [shape: f32[8,48], index: 1, kind: input, shape index: {}]   ;;  %s3470_s2 = inlined_call_operand.vmem [shape: f32[1,48], index: 2, kind: input, shape index: {}]   ;;  %s3471_s3 = inlined_call_operand.vmem [shape: f32[9,48], index: 3, kind: input, shape index: {}]   ;;  %s3472_s4 = inlined_call_operand.vmem [shape: f32[1,48], index: 4, kind: input, shape index: {}]   ;;  %s3473_s5 = inlined_call_operand.vmem [shape: f32[8,48], index: 5, kind: input, shape index: {}]   ;;  %s3474_s6 = inlined_call_operand.vmem [shape: f32[8,1], index: 6, kind: input, shape index: {}]   ;;  %s3475_s7 = inlined_call_operand.vmem [shape: f32[2,8,256], index: 7, kind: output, shape index: {}]  }
   0x1 LB: > { %s2045_s25 = sadd.s32 4294967295, %s2331_s24   ;;  %p2049_p0 = scmp.ge.s32.totalorder %s2331_s24, 1  ;;  %s2331_s24 = sphi %s2375_s24, %s17_s24  }
   0x2   : > { %p237_p1 = scmp.lt.s32.totalorder %s2331_s24, 3 }
   0x4   : > { %p238_p2 = pnand %p2049_p0, %p237_p1 }
   0x6   : > { %241 = sbr.rel (%p238_p2) target bundleno = 800 (0x320), region = 48 }
   0xd   : > { %p269_p3 = scmp.lt.s32.totalorder %s2045_s25, 1  ;;  %v345_v1 = vld [vmem:[%s3469_s1] sm:$0xff]  ;;  %vm353_vm0 = vcmask 64512   ;;  %vm739_vm1 = vcmask 392192   ;;  %vm742_vm2 = vcmask 386048   ;;  %v2333_v27 = vmov 0.0  }
   0xe   : > { %2201 = vmatprep.subr.mxu0 %v345_v1  ;;  %745 = vst.msk [vmem:[#allocation2 + $0x20] sm:$0xff] %vm739_vm1, %v2333_v27  ;;  %740 = vst.msk [vmem:[#allocation2] sm:$0xff] %vm739_vm1, %v2333_v27  ;;  %v2487_v36 = vld [vmem:[%s3470_s2] ss:$0 sm:$0xff]  ;;  %v2499_v42 = vld [vmem:[%s3471_s3 + $0x1] ss:$0 sm:$0xff] }
   0xf   : > { %s3513_s25 = smov (!%p269_p3, %s2045_s25), 1  ;;  %2202 = vmatpush3.msra.mxu0 %v345_v1  ;;  %746 = vst.msk [vmem:[#allocation2 + $0x28] sm:$0x3] %vm742_vm2, %v2333_v27  ;;  %743 = vst.msk [vmem:[#allocation2 + $0x10] sm:$0x3] %vm742_vm2, %v2333_v27 }
  0x10   : > { %s2132_s26 = sshll.u32 %s3513_s25, 4  ;;  %741 = vst.msk [vmem:[#allocation2 + $0x8] sm:$0xff] %vm739_vm1, %v2333_v27  ;;  %744 = vst.msk [vmem:[#allocation2 + $0x18] sm:$0xff] %vm739_vm1, %v2333_v27  ;;  %v2493_v40 = vld [vmem:[%s3471_s3] ss:$0 sm:$0xff] }
  0x11   : > { %s2391_s29 = scalar_lea.vmem %s3468_s0, %s2132_s26  ;;  %747 = vst.msk [vmem:[#allocation2 + $0x30] sm:$0xff] %vm739_vm1, %v2333_v27  ;;  %748 = vst.msk [vmem:[#allocation2 + $0x38] sm:$0xff] %vm739_vm1, %v2333_v27  ;;  %v2509_v55 = vld [vmem:[%s3471_s3 + $0x2] ss:$0 sm:$0xff]  ;;  %s278_s23 = scalar_lea.vmem %s3475_s7, %s2132_s26 }
  0x12   : > { %v279_v0 = vld [vmem:[%s2391_s29] sm:$0xff]  ;;  %v280_v2 = vld [vmem:[%s2391_s29 + $0x8] sm:$0xff]  ;;  %749 = vst.msk [vmem:[#allocation2 + $0x40] sm:$0x3] %vm742_vm2, %v2333_v27  ;;  %752 = vst.msk [vmem:[#allocation2 + $0x58] sm:$0x3] %vm742_vm2, %v2333_v27 }
  0x13   : > { %281 = vxpose.xlu0.b32.start.end [1/1] (short) %v279_v0, 128  ;;  %750 = vst.msk [vmem:[#allocation2 + $0x48] sm:$0xff] %vm739_vm1, %v2333_v27  ;;  %751 = vst.msk [vmem:[#allocation2 + $0x50] sm:$0xff] %vm739_vm1, %v2333_v27 }
  0x14   : > { %753 = vst.msk [vmem:[#allocation2 + $0x60] sm:$0xff] %vm739_vm1, %v2333_v27  ;;  %754 = vst.msk [vmem:[#allocation2 + $0x68] sm:$0xff] %vm739_vm1, %v2333_v27 }
  0x15   : > { %755 = vst.msk [vmem:[#allocation2 + $0x70] sm:$0x3] %vm742_vm2, %v2333_v27  ;;  %758 = vst.msk [vmem:[#allocation2 + $0x88] sm:$0x3] %vm742_vm2, %v2333_v27  ;;  %v828_v43 = vld [vmem:[#allocation2] sm:$0xff] }
  0x16   : > { %756 = vst.msk [vmem:[#allocation2 + $0x78] sm:$0xff] %vm739_vm1, %v2333_v27  ;;  %757 = vst.msk [vmem:[#allocation2 + $0x80] sm:$0xff] %vm739_vm1, %v2333_v27  ;;  %v865_v50 = vmul.f32 %v2493_v40, %v828_v43 }
  0x17   : > { %759 = vst.msk [vmem:[#allocation2 + $0x90] sm:$0xff] %vm739_vm1, %v2333_v27  ;;  %760 = vst.msk [vmem:[#allocation2 + $0x98] sm:$0xff] %vm739_vm1, %v2333_v27  ;;  %v897_v44 = vld [vmem:[#allocation2 + $0x1] sm:$0xff]  ;;  %v898_v47 = vld [vmem:[#allocation2 + $0x9] sm:$0xff] }
  0x18   : > { %761 = vst.msk [vmem:[#allocation2 + $0xa0] sm:$0x3] %vm742_vm2, %v2333_v27  ;;  %764 = vst.msk [vmem:[#allocation2 + $0xb8] sm:$0x3] %vm742_vm2, %v2333_v27  ;;  %v829_v46 = vld [vmem:[#allocation2 + $0x8] sm:$0xff]  ;;  %v934_v51 = vmul.f32 %v2499_v42, %v897_v44  ;;  %v935_v54 = vmul.f32 %v2499_v42, %v898_v47 }
  0x19   : > { %762 = vst.msk [vmem:[#allocation2 + $0xa8] sm:$0xff] %vm739_vm1, %v2333_v27  ;;  %763 = vst.msk [vmem:[#allocation2 + $0xb0] sm:$0xff] %vm739_vm1, %v2333_v27  ;;  %v866_v53 = vmul.f32 %v2493_v40, %v829_v46  ;;  %v998_v56 = vld [vmem:[#allocation2 + $0x2] sm:$0xff]  ;;  %v999_v57 = vld [vmem:[#allocation2 + $0xa] sm:$0xff] }
  0x1a   : > { %765 = vst.msk [vmem:[#allocation2 + $0xc0] sm:$0xff] %vm739_vm1, %v2333_v27  ;;  %766 = vst.msk [vmem:[#allocation2 + $0xc8] sm:$0xff] %vm739_vm1, %v2333_v27  ;;  %v966_v61 = vadd.f32 %v934_v51, %v865_v50  ;;  %v1035_v0 = vmul.f32 %v2509_v55, %v998_v56  ;;  %v1036_v1 = vmul.f32 %v2509_v55, %v999_v57  ;;  %v2560_v47 = vld [vmem:[%s3471_s3 + $0x6] ss:$0 sm:$0xff] }
  0x1b   : > { %767 = vst.msk [vmem:[#allocation2 + $0xd0] sm:$0x3] %vm742_vm2, %v2333_v27  ;;  %770 = vst.msk [vmem:[#allocation2 + $0xe8] sm:$0x3] %vm742_vm2, %v2333_v27  ;;  %v967_v63 = vadd.f32 %v935_v54, %v866_v53 }
  0x1c   : > { %768 = vst.msk [vmem:[#allocation2 + $0xd8] sm:$0xff] %vm739_vm1, %v2333_v27  ;;  %769 = vst.msk [vmem:[#allocation2 + $0xe0] sm:$0xff] %vm739_vm1, %v2333_v27 }
  0x1d   : > { %771 = vst.msk [vmem:[#allocation2 + $0xf0] sm:$0xff] %vm739_vm1, %v2333_v27  ;;  %772 = vst.msk [vmem:[#allocation2 + $0xf8] sm:$0xff] %vm739_vm1, %v2333_v27 }
  0x1e   : > { %773 = vst.msk [vmem:[#allocation2 + $0x100] sm:$0x3] %vm742_vm2, %v2333_v27  ;;  %776 = vst.msk [vmem:[#allocation2 + $0x118] sm:$0x3] %vm742_vm2, %v2333_v27 }
  0x1f   : > { %774 = vst.msk [vmem:[#allocation2 + $0x108] sm:$0xff] %vm739_vm1, %v2333_v27  ;;  %775 = vst.msk [vmem:[#allocation2 + $0x110] sm:$0xff] %vm739_vm1, %v2333_v27 }
  0x20   : > { %777 = vst.msk [vmem:[#allocation2 + $0x120] sm:$0xff] %vm739_vm1, %v2333_v27  ;;  %778 = vst.msk [vmem:[#allocation2 + $0x128] sm:$0xff] %vm739_vm1, %v2333_v27 }
  0x21   : > { %779 = vst.msk [vmem:[#allocation2 + $0x130] sm:$0x3] %vm742_vm2, %v2333_v27  ;;  %782 = vst.msk [vmem:[#allocation2 + $0x148] sm:$0x3] %vm742_vm2, %v2333_v27 }
  0x22   : > { %780 = vst.msk [vmem:[#allocation2 + $0x138] sm:$0xff] %vm739_vm1, %v2333_v27  ;;  %781 = vst.msk [vmem:[#allocation2 + $0x140] sm:$0xff] %vm739_vm1, %v2333_v27 }
  0x23   : > { %783 = vst.msk [vmem:[#allocation2 + $0x150] sm:$0xff] %vm739_vm1, %v2333_v27  ;;  %784 = vst.msk [vmem:[#allocation2 + $0x158] sm:$0xff] %vm739_vm1, %v2333_v27 }
  0x24   : > { %785 = vst.msk [vmem:[#allocation2 + $0x160] sm:$0x3] %vm742_vm2, %v2333_v27  ;;  %788 = vst.msk [vmem:[#allocation2 + $0x178] sm:$0x3] %vm742_vm2, %v2333_v27 }
  0x25   : > { %786 = vst.msk [vmem:[#allocation2 + $0x168] sm:$0xff] %vm739_vm1, %v2333_v27  ;;  %787 = vst.msk [vmem:[#allocation2 + $0x170] sm:$0xff] %vm739_vm1, %v2333_v27 }
  0x26   : > { %789 = vst.msk [vmem:[#allocation2 + $0x180] sm:$0xff] %vm739_vm1, %v2333_v27  ;;  %790 = vst.msk [vmem:[#allocation2 + $0x188] sm:$0xff] %vm739_vm1, %v2333_v27 }
  0x27   : > { %791 = vst.msk [vmem:[#allocation2 + $0x190] sm:$0x3] %vm742_vm2, %v2333_v27  ;;  %794 = vst.msk [vmem:[#allocation2 + $0x1a8] sm:$0x3] %vm742_vm2, %v2333_v27 }
  0x28   : > { %792 = vst.msk [vmem:[#allocation2 + $0x198] sm:$0xff] %vm739_vm1, %v2333_v27  ;;  %793 = vst.msk [vmem:[#allocation2 + $0x1a0] sm:$0xff] %vm739_vm1, %v2333_v27 }
  0x29   : > { %vm2921_vm3 = vmpackc.low %vm739_vm1, %vm739_vm1 }
  0x50   : > { %313 = vxpose.xlu0.b32.start.end [1/1] (short) %v280_v2, 128 }
  0x93   : > { %v297_v3 = vpop.trf.xlu0 }
  0x94   : > { %2203 = vmatprep.mubr.msk.f32.mxu0 %vm353_vm0, %v297_v3 }
  0x97   : > { %v298_v4 = vpop.trf.xlu0 }
  0x98   : > { %2204 = vmatmul.mubr.msk.f32.vlgmr.msra.gmra.mrb[0].mxu0 %vm353_vm0, %v298_v4  ;;  %v2519_v4 = vld [vmem:[%s3471_s3 + $0x4] ss:$0 sm:$0xff] }
  0x9b   : > { %v299_v5 = vpop.trf.xlu0 }
  0x9c   : > { %2206 = vmatprep.mubr.msk.f32.mxu0 %vm353_vm0, %v299_v5 }
  0x9f   : > { %v300_v6 = vpop.trf.xlu0 }
  0xa0   : > { %2207 = vmatmul.mubr.msk.f32.gmra.mrb[2].mxu0 %vm353_vm0, %v300_v6  ;;  %v2524_v6 = vld [vmem:[%s3471_s3 + $0x3] ss:$0 sm:$0xff] }
  0xa3   : > { %v301_v7 = vpop.trf.xlu0 }
  0xa4   : > { %2209 = vmatprep.mubr.msk.f32.mxu0 %vm353_vm0, %v301_v7  ;;  %v2529_v7 = vld [vmem:[%s3471_s3 + $0x5] ss:$0 sm:$0xff] }
  0xa7   : > { %v302_v8 = vpop.trf.xlu0 }
  0xa8   : > { %2210 = vmatmul.mubr.msk.f32.gmra.mrb[4].mxu0 %vm353_vm0, %v302_v8 }
  0xab   : > { %v303_v9 = vpop.trf.xlu0 }
  0xac   : > { %2212 = vmatprep.mubr.msk.f32.mxu0 %vm353_vm0, %v303_v9  ;;  %v1067_v9 = vadd.f32 %v1035_v0, %v966_v61 }
  0xaf   : > { %v304_v10 = vpop.trf.xlu0 }
  0xb0   : > { %2213 = vmatmul.mubr.msk.f32.gmra.mrb[6].mxu0 %vm353_vm0, %v304_v10  ;;  %v1068_v10 = vadd.f32 %v1036_v1, %v967_v63 }
  0xb3   : > { %v305_v11 = vpop.trf.xlu0 }
  0xb4   : > { %2215 = vmatprep.mubr.msk.f32.mxu0 %vm353_vm0, %v305_v11 }
  0xb7   : > { %v306_v12 = vpop.trf.xlu0 }
  0xb8   : > { %2216 = vmatmul.mubr.msk.f32.gmra.mrb[8].mxu0 %vm353_vm0, %v306_v12 }
  0xbb   : > { %v307_v13 = vpop.trf.xlu0 }
  0xbc   : > { %2218 = vmatprep.mubr.msk.f32.mxu0 %vm353_vm0, %v307_v13 }
  0xbf   : > { %v308_v14 = vpop.trf.xlu0 }
  0xc0   : > { %2219 = vmatmul.mubr.msk.f32.gmra.mrb[10].mxu0 %vm353_vm0, %v308_v14 }
  0xc3   : > { %v309_v15 = vpop.trf.xlu0 }
  0xc4   : > { %2221 = vmatprep.mubr.msk.f32.mxu0 %vm353_vm0, %v309_v15 }
  0xc7   : > { %v310_v16 = vpop.trf.xlu0 }
  0xc8   : > { %2222 = vmatmul.mubr.msk.f32.gmra.mrb[12].mxu0 %vm353_vm0, %v310_v16 }
  0xcb   : > { %v311_v17 = vpop.trf.xlu0 }
  0xcc   : > { %2224 = vmatprep.mubr.msk.f32.mxu0 %vm353_vm0, %v311_v17 }
  0xcf   : > { %v312_v18 = vpop.trf.xlu0 }
  0xd0   : > { %2225 = vmatmul.mubr.msk.f32.gmra.mrb[14].mxu0 %vm353_vm0, %v312_v18 }
  0xd3   : > { %v329_v19 = vpop.trf.xlu0 }
  0xd4   : > { %2227 = vmatprep.mubr.msk.f32.mxu0 %vm353_vm0, %v329_v19 }
  0xd7   : > { %v330_v20 = vpop.trf.xlu0 }
  0xd8   : > { %2228 = vmatmul.mubr.msk.f32.gmra.mrb[16].mxu0 %vm353_vm0, %v330_v20 }
  0xdb   : > { %v331_v21 = vpop.trf.xlu0 }
  0xdc   : > { %2230 = vmatprep.mubr.msk.f32.mxu0 %vm353_vm0, %v331_v21 }
  0xdf   : > { %v332_v22 = vpop.trf.xlu0 }
  0xe0   : > { %2231 = vmatmul.mubr.msk.f32.gmra.mrb[18].mxu0 %vm353_vm0, %v332_v22 }
  0xe3   : > { %v333_v23 = vpop.trf.xlu0 }
  0xe4   : > { %2233 = vmatprep.mubr.msk.f32.mxu0 %vm353_vm0, %v333_v23 }
  0xe7   : > { %v334_v24 = vpop.trf.xlu0 }
  0xe8   : > { %2234 = vmatmul.mubr.msk.f32.gmra.mrb[20].mxu0 %vm353_vm0, %v334_v24 }
  0xeb   : > { %v335_v25 = vpop.trf.xlu0 }
  0xec   : > { %2236 = vmatprep.mubr.msk.f32.mxu0 %vm353_vm0, %v335_v25 }
  0xef   : > { %v336_v26 = vpop.trf.xlu0 }
  0xf0   : > { %2237 = vmatmul.mubr.msk.f32.gmra.mrb[22].mxu0 %vm353_vm0, %v336_v26 }
  0xf3   : > { %v337_v28 = vpop.trf.xlu0 }
  0xf4   : > { %2239 = vmatprep.mubr.msk.f32.mxu0 %vm353_vm0, %v337_v28 }
  0xf7   : > { %v338_v29 = vpop.trf.xlu0 }
  0xf8   : > { %2240 = vmatmul.mubr.msk.f32.gmra.mrb[24].mxu0 %vm353_vm0, %v338_v29 }
  0xfb   : > { %v339_v30 = vpop.trf.xlu0 }
  0xfc   : > { %2242 = vmatprep.mubr.msk.f32.mxu0 %vm353_vm0, %v339_v30 }
  0xff   : > { %v340_v31 = vpop.trf.xlu0 }
 0x100   : > { %2243 = vmatmul.mubr.msk.f32.gmra.mrb[26].mxu0 %vm353_vm0, %v340_v31 }
 0x103   : > { %v341_v32 = vpop.trf.xlu0 }
 0x104   : > { %2245 = vmatprep.mubr.msk.f32.mxu0 %vm353_vm0, %v341_v32 }
 0x107   : > { %v342_v33 = vpop.trf.xlu0 }
 0x108   : > { %2246 = vmatmul.mubr.msk.f32.gmra.mrb[28].mxu0 %vm353_vm0, %v342_v33 }
 0x10b   : > { %v343_v34 = vpop.trf.xlu0 }
 0x10c   : > { %2248 = vmatprep.mubr.msk.f32.mxu0 %vm353_vm0, %v343_v34 }
 0x10f   : > { %v344_v35 = vpop.trf.xlu0 }
 0x110   : > { %2249 = vmatmul.mubr.msk.f32.gmra.mrb[30].mxu0 %vm353_vm0, %v344_v35 }
 0x16b   : > { %v2205_v37 = vpop.f32.mrb[0].mxu0 }
 0x16c   : > { %v522_v38 = vadd.f32 %v2205_v37, %v2487_v36  ;;  %v516_v39 = vpop.f32.mrb[1].mxu0 }
 0x16d   : > { %v517_v41 = vadd.f32 %v2487_v36, %v516_v39  ;;  %v2549_v39 = vld [vmem:[%s3471_s3 + $0x7] ss:$0 sm:$0xff] }
 0x16e   : > { %v676_v45 = vmax.f32 %v522_v38, 0.0 }
 0x16f   : > { %v675_v48 = vmax.f32 %v517_v41, 0.0  ;;  %v2554_v41 = vld [vmem:[%s3471_s3 + $0x8] ss:$0 sm:$0xff] }
 0x170   : > { %v708_v49 = vmin.f32 %v676_v45, 6.0 }
 0x171   : > { %v707_v52 = vmin.f32 %v675_v48, 6.0 }
 0x172   : > { %797 = vst.msk [vmem:[#allocation2 + $0x21] sm:$0xff] %vm739_vm1, %v708_v49 }
 0x173   : > { %796 = vst.msk [vmem:[#allocation2 + $0x19] sm:$0xff] %vm739_vm1, %v707_v52  ;;  %v2208_v58 = vpop.f32.mrb[2].mxu0 }
 0x174   : > { %v532_v59 = vadd.f32 %v2208_v58, %v2487_v36  ;;  %v526_v60 = vpop.f32.mrb[3].mxu0 }
 0x175   : > { %v527_v62 = vadd.f32 %v2487_v36, %v526_v60 }
 0x176   : > { %v678_v2 = vmax.f32 %v532_v59, 0.0 }
 0x177   : > { %v677_v3 = vmax.f32 %v527_v62, 0.0 }
 0x178   : > { %v710_v5 = vmin.f32 %v678_v2, 6.0 }
 0x179   : > { %v709_v8 = vmin.f32 %v677_v3, 6.0  ;;  %v1201_v11 = vld [vmem:[#allocation2 + $0x21] sm:$0xff] }
 0x17a   : > { %v1302_v12 = vld [vmem:[#allocation2 + $0x22] sm:$0xff]  ;;  %799 = vst.msk [vmem:[#allocation2 + $0x39] sm:$0xff] %vm739_vm1, %v710_v5  ;;  %v1099_v13 = vld [vmem:[#allocation2 + $0x18] sm:$0xff]  ;;  %v1238_v16 = vmul.f32 %v2519_v4, %v1201_v11  ;;  %v937_v17 = vmul.f32 %v2499_v42, %v1201_v11 }
 0x17b   : > { %v1100_v14 = vld [vmem:[#allocation2 + $0x20] sm:$0xff]  ;;  %798 = vst.msk [vmem:[#allocation2 + $0x31] sm:$0xff] %vm739_vm1, %v709_v8  ;;  %v2211_v18 = vpop.f32.mrb[4].mxu0  ;;  %v1136_v19 = vmul.f32 %v2524_v6, %v1099_v13  ;;  %v1339_v22 = vmul.f32 %v2529_v7, %v1302_v12  ;;  %v867_v23 = vmul.f32 %v2493_v40, %v1099_v13  ;;  %v1038_v28 = vmul.f32 %v2509_v55, %v1302_v12 }
 0x17c   : > { %v1200_v15 = vld [vmem:[#allocation2 + $0x19] sm:$0xff]  ;;  %v1137_v20 = vmul.f32 %v2524_v6, %v1100_v14  ;;  %v542_v24 = vadd.f32 %v2211_v18, %v2487_v36  ;;  %v536_v25 = vpop.f32.mrb[5].mxu0  ;;  %v868_v26 = vmul.f32 %v2493_v40, %v1100_v14 }
 0x17d   : > { %v1301_v21 = vld [vmem:[#allocation2 + $0x1a] sm:$0xff]  ;;  %v936_v27 = vmul.f32 %v2499_v42, %v1200_v15  ;;  %v537_v29 = vadd.f32 %v2487_v36, %v536_v25  ;;  %v1168_v30 = vadd.f32 %v1136_v19, %v1067_v9  ;;  %v1237_v32 = vmul.f32 %v2519_v4, %v1200_v15 }
 0x17e   : > { %v1169_v31 = vadd.f32 %v1137_v20, %v1068_v10  ;;  %v680_v33 = vmax.f32 %v542_v24, 0.0  ;;  %v969_v35 = vadd.f32 %v937_v17, %v868_v26  ;;  %v1037_v37 = vmul.f32 %v2509_v55, %v1301_v21  ;;  %v2586_v26 = vld [vmem:[%s3472_s4] ss:$0 sm:$0xff] }
 0x17f   : > { %v968_v34 = vadd.f32 %v936_v27, %v867_v23  ;;  %v679_v38 = vmax.f32 %v537_v29, 0.0  ;;  %v1269_v43 = vadd.f32 %v1237_v32, %v1168_v30  ;;  %v1338_v45 = vmul.f32 %v2529_v7, %v1301_v21 }
 0x180   : > { %v1270_v44 = vadd.f32 %v1238_v16, %v1169_v31  ;;  %v712_v46 = vmin.f32 %v680_v33, 6.0  ;;  %v1070_v54 = vadd.f32 %v1038_v28, %v969_v35 }
 0x181   : > { %v1069_v48 = vadd.f32 %v1037_v37, %v968_v34  ;;  %v711_v49 = vmin.f32 %v679_v38, 6.0  ;;  %v1370_v50 = vadd.f32 %v1338_v45, %v1269_v43  ;;  %v1505_v52 = vld [vmem:[#allocation2 + $0x39] sm:$0xff] }
 0x182   : > { %v1371_v51 = vadd.f32 %v1339_v22, %v1270_v44  ;;  %v2562_v53 = vld [vmem:[#allocation2 + $0x3a] sm:$0xff]  ;;  %801 = vst.msk [vmem:[#allocation2 + $0x51] sm:$0xff] %vm739_vm1, %v712_v46  ;;  %v1403_v56 = vld [vmem:[#allocation2 + $0x30] sm:$0xff]  ;;  %v1542_v59 = vmul.f32 %v2549_v39, %v1505_v52  ;;  %v1240_v61 = vmul.f32 %v2519_v4, %v1505_v52 }
 0x183   : > { %v1404_v57 = vld [vmem:[#allocation2 + $0x38] sm:$0xff]  ;;  %v1643_v60 = vmul.f32 %v2554_v41, %v2562_v53  ;;  %v1341_v62 = vmul.f32 %v2529_v7, %v2562_v53  ;;  %800 = vst.msk [vmem:[#allocation2 + $0x49] sm:$0xff] %vm739_vm1, %v711_v49  ;;  %v2214_v63 = vpop.f32.mrb[6].mxu0  ;;  %v1440_v0 = vmul.f32 %v2560_v47, %v1403_v56  ;;  %v1138_v5 = vmul.f32 %v2524_v6, %v1403_v56 }
 0x184   : > { %v1504_v58 = vld [vmem:[#allocation2 + $0x31] sm:$0xff]  ;;  %v1441_v1 = vmul.f32 %v2560_v47, %v1404_v57  ;;  %v552_v8 = vadd.f32 %v2214_v63, %v2487_v36  ;;  %v546_v9 = vpop.f32.mrb[7].mxu0  ;;  %v1139_v11 = vmul.f32 %v2524_v6, %v1404_v57  ;;  %v869_v20 = vmul.f32 %v2493_v40, %v1403_v56 }
 0x185   : > { %v1541_v2 = vmul.f32 %v2549_v39, %v1504_v58  ;;  %v1605_v3 = vld [vmem:[#allocation2 + $0x32] sm:$0xff]  ;;  %v1239_v12 = vmul.f32 %v2519_v4, %v1504_v58  ;;  %v547_v13 = vadd.f32 %v2487_v36, %v546_v9  ;;  %v1472_v14 = vadd.f32 %v1440_v0, %v1370_v50 }
 0x186   : > { %v1642_v10 = vmul.f32 %v2554_v41, %v1605_v3  ;;  %v1473_v15 = vadd.f32 %v1441_v1, %v1371_v51  ;;  %v1170_v16 = vadd.f32 %v1138_v5, %v1069_v48  ;;  %v682_v17 = vmax.f32 %v552_v8, 0.0 }
 0x187   : > { %v1171_v18 = vadd.f32 %v1139_v11, %v1070_v54  ;;  %v1340_v19 = vmul.f32 %v2529_v7, %v1605_v3  ;;  %v681_v21 = vmax.f32 %v547_v13, 0.0  ;;  %v1573_v22 = vadd.f32 %v1541_v2, %v1472_v14 }
 0x188   : > { %v1574_v23 = vadd.f32 %v1542_v59, %v1473_v15  ;;  %v1271_v24 = vadd.f32 %v1239_v12, %v1170_v16  ;;  %v714_v25 = vmin.f32 %v682_v17, 6.0  ;;  %v870_v28 = vmul.f32 %v2493_v40, %v1404_v57 }
 0x189   : > { %v1272_v27 = vadd.f32 %v1240_v61, %v1171_v18  ;;  %v938_v29 = vmul.f32 %v2499_v42, %v1504_v58  ;;  %v713_v30 = vmin.f32 %v681_v21, 6.0  ;;  %v1674_v31 = vadd.f32 %v1642_v10, %v1573_v22  ;;  %v2590_v34 = vld [vmem:[#allocation2 + $0x51] sm:$0xff] }
 0x18a   : > { %v1675_v32 = vadd.f32 %v1643_v60, %v1574_v23  ;;  %v1372_v33 = vadd.f32 %v1340_v19, %v1271_v24  ;;  %v2592_v35 = vld [vmem:[#allocation2 + $0x52] sm:$0xff]  ;;  %803 = vst.msk [vmem:[#allocation2 + $0x69] sm:$0xff] %vm739_vm1, %v714_v25  ;;  %v2595_v38 = vld [vmem:[#allocation2 + $0x48] sm:$0xff]  ;;  %v1544_v45 = vmul.f32 %v2549_v39, %v2590_v34  ;;  %v939_v48 = vmul.f32 %v2499_v42, %v1505_v52 }
 0x18b   : > { %v1373_v37 = vadd.f32 %v1341_v62, %v1272_v27  ;;  %v2597_v43 = vld [vmem:[#allocation2 + $0x50] sm:$0xff]  ;;  %v1645_v46 = vmul.f32 %v2554_v41, %v2592_v35  ;;  %802 = vst.msk [vmem:[#allocation2 + $0x61] sm:$0xff] %vm739_vm1, %v713_v30  ;;  %v2217_v49 = vpop.f32.mrb[8].mxu0  ;;  %v1713_v50 = vadd.f32 %v2586_v26, %v1674_v31  ;;  %v1442_v54 = vmul.f32 %v2560_v47, %v2595_v38 }
 0x18c   : > { %v2599_v44 = vld [vmem:[#allocation2 + $0x49] sm:$0xff]  ;;  %v1714_v51 = vadd.f32 %v2586_v26, %v1675_v32  ;;  %v1443_v56 = vmul.f32 %v2560_v47, %v2597_v43  ;;  %v562_v58 = vadd.f32 %v2217_v49, %v2487_v36  ;;  %v556_v59 = vpop.f32.mrb[9].mxu0  ;;  %v970_v61 = vadd.f32 %v938_v29, %v869_v20 }
 0x18d   : > { %v2613_v57 = vld [vmem:[#allocation2 + $0x4a] sm:$0xff]  ;;  %v1543_v52 = vmul.f32 %v2549_v39, %v2599_v44  ;;  %v557_v62 = vadd.f32 %v2487_v36, %v556_v59  ;;  %v1745_v63 = vmax.f32 %v1713_v50, 0.0  ;;  %v1474_v1 = vadd.f32 %v1442_v54, %v1372_v33 }
 0x18e   : > { %v1644_v60 = vmul.f32 %v2554_v41, %v2613_v57  ;;  %v1746_v0 = vmax.f32 %v1714_v51, 0.0  ;;  %v684_v2 = vmax.f32 %v562_v58, 0.0  ;;  %v1475_v5 = vadd.f32 %v1443_v56, %v1373_v37 }
 0x18f   : > { %v971_v8 = vadd.f32 %v939_v48, %v870_v28  ;;  %v1039_v9 = vmul.f32 %v2509_v55, %v1605_v3  ;;  %v683_v10 = vmax.f32 %v557_v62, 0.0  ;;  %v2622_v11 = vmin.f32 %v1745_v63, 6.0 }
 0x190   : > { %v2624_v12 = vmin.f32 %v1746_v0, 6.0  ;;  %v1575_v13 = vadd.f32 %v1543_v52, %v1474_v1  ;;  %v716_v14 = vmin.f32 %v684_v2, 6.0  ;;  %v1576_v15 = vadd.f32 %v1544_v45, %v1475_v5 }
 0x191   : > { %v1040_v16 = vmul.f32 %v2509_v55, %v2562_v53  ;;  %v1071_v17 = vadd.f32 %v1039_v9, %v970_v61  ;;  %v715_v18 = vmin.f32 %v683_v10, 6.0  ;;  %v1140_v3 = vmul.f32 %v2524_v6, %v2595_v38  ;;  %v2656_v56 = vld [vmem:[#allocation2 + $0x69] sm:$0xff] }
 0x192   : > { %v1676_v20 = vadd.f32 %v1644_v60, %v1575_v13  ;;  %805 = vst.msk [vmem:[#allocation2 + $0x81] sm:$0xff] %vm739_vm1, %v716_v14  ;;  %v1677_v21 = vadd.f32 %v1645_v46, %v1576_v15  ;;  %v1141_v23 = vmul.f32 %v2524_v6, %v2597_v43  ;;  %v1241_v24 = vmul.f32 %v2519_v4, %v2599_v44  ;;  %v2637_v53 = vld [vmem:[#allocation2 + $0x60] sm:$0xff]  ;;  %v2645_v31 = vld [vmem:[#allocation2 + $0x68] sm:$0xff] }
 0x193   : > { %v1072_v22 = vadd.f32 %v1040_v16, %v971_v8  ;;  %804 = vst.msk [vmem:[#allocation2 + $0x79] sm:$0xff] %vm739_vm1, %v715_v18  ;;  %v2220_v25 = vpop.f32.mrb[10].mxu0  ;;  %v1172_v28 = vadd.f32 %v1140_v3, %v1071_v17  ;;  %v1242_v29 = vmul.f32 %v2519_v4, %v2590_v34  ;;  %v1342_v30 = vmul.f32 %v2529_v7, %v2613_v57  ;;  %v2651_v48 = vld [vmem:[#allocation2 + $0x61] sm:$0xff]  ;;  %v2662_v62 = vld [vmem:[#allocation2 + $0x6a] sm:$0xff] }
 0x194   : > { %v1715_v27 = vadd.f32 %v2586_v26, %v1676_v20  ;;  %v572_v32 = vadd.f32 %v2220_v25, %v2487_v36  ;;  %v566_v33 = vpop.f32.mrb[11].mxu0  ;;  %v1716_v37 = vadd.f32 %v2586_v26, %v1677_v21  ;;  %v1343_v46 = vmul.f32 %v2529_v7, %v2592_v35  ;;  %v2660_v61 = vld [vmem:[#allocation2 + $0x62] sm:$0xff] }
 0x195   : > { %v1173_v45 = vadd.f32 %v1141_v23, %v1072_v22  ;;  %v567_v49 = vadd.f32 %v2487_v36, %v566_v33  ;;  %v1273_v51 = vadd.f32 %v1241_v24, %v1172_v28  ;;  %v1444_v54 = vmul.f32 %v2560_v47, %v2637_v53 }
 0x196   : > { %v1747_v50 = vmax.f32 %v1715_v27, 0.0  ;;  %v686_v58 = vmax.f32 %v572_v32, 0.0  ;;  %v1748_v59 = vmax.f32 %v1716_v37, 0.0  ;;  %v1445_v60 = vmul.f32 %v2560_v47, %v2645_v31 }
 0x197   : > { %v1274_v52 = vadd.f32 %v1242_v29, %v1173_v45  ;;  %v685_v63 = vmax.f32 %v567_v49, 0.0  ;;  %v1374_v1 = vadd.f32 %v1342_v30, %v1273_v51  ;;  %v1545_v2 = vmul.f32 %v2549_v39, %v2651_v48 }
 0x198   : > { %v2664_v0 = vmin.f32 %v1747_v50, 6.0  ;;  %v718_v5 = vmin.f32 %v686_v58, 6.0  ;;  %v2668_v8 = vmin.f32 %v1748_v59, 6.0  ;;  %v1546_v10 = vmul.f32 %v2549_v39, %v2656_v56 }
 0x199   : > { %v1375_v9 = vadd.f32 %v1343_v46, %v1274_v52  ;;  %v717_v13 = vmin.f32 %v685_v63, 6.0  ;;  %v1476_v14 = vadd.f32 %v1444_v54, %v1374_v1  ;;  %v1646_v15 = vmul.f32 %v2554_v41, %v2660_v61 }
 0x19a   : > { %v1647_v16 = vmul.f32 %v2554_v41, %v2662_v62  ;;  %807 = vst.msk [vmem:[#allocation2 + $0x99] sm:$0xff] %vm739_vm1, %v718_v5  ;;  %v871_v20 = vmul.f32 %v2493_v40, %v2595_v38  ;;  %v872_v3 = vmul.f32 %v2493_v40, %v2597_v43  ;;  %v940_v23 = vmul.f32 %v2499_v42, %v2599_v44  ;;  %v2701_v51 = vld [vmem:[#allocation2 + $0x78] sm:$0xff]  ;;  %v2703_v54 = vld [vmem:[#allocation2 + $0x80] sm:$0xff] }
 0x19b   : > { %v1477_v18 = vadd.f32 %v1445_v60, %v1375_v9  ;;  %806 = vst.msk [vmem:[#allocation2 + $0x91] sm:$0xff] %vm739_vm1, %v717_v13  ;;  %v2223_v21 = vpop.f32.mrb[12].mxu0  ;;  %v1577_v22 = vadd.f32 %v1545_v2, %v1476_v14  ;;  %v941_v24 = vmul.f32 %v2499_v42, %v2590_v34  ;;  %v1041_v25 = vmul.f32 %v2509_v55, %v2613_v57  ;;  %v2710_v63 = vld [vmem:[#allocation2 + $0x79] sm:$0xff] }
 0x19c   : > { %v582_v27 = vadd.f32 %v2223_v21, %v2487_v36  ;;  %v576_v28 = vpop.f32.mrb[13].mxu0  ;;  %v1042_v43 = vmul.f32 %v2509_v55, %v2592_v35  ;;  %v1142_v29 = vmul.f32 %v2524_v6, %v2637_v53  ;;  %v972_v44 = vadd.f32 %v940_v23, %v871_v20  ;;  %v2714_v13 = vld [vmem:[#allocation2 + $0x7a] sm:$0xff]  ;;  %v2723_v20 = vld [vmem:[#allocation2 + $0x82] sm:$0xff] }
 0x19d   : > { %v1578_v38 = vadd.f32 %v1546_v10, %v1477_v18  ;;  %v577_v30 = vadd.f32 %v2487_v36, %v576_v28  ;;  %v1678_v32 = vadd.f32 %v1646_v15, %v1577_v22  ;;  %v973_v33 = vadd.f32 %v941_v24, %v872_v3  ;;  %v2712_v10 = vld [vmem:[#allocation2 + $0x81] sm:$0xff] }
 0x19e   : > { %v688_v37 = vmax.f32 %v582_v27, 0.0  ;;  %v1143_v57 = vmul.f32 %v2524_v6, %v2645_v31  ;;  %v1243_v45 = vmul.f32 %v2519_v4, %v2651_v48  ;;  %v1073_v35 = vadd.f32 %v1041_v25, %v972_v44 }
 0x19f   : > { %v1679_v34 = vadd.f32 %v1647_v16, %v1578_v38  ;;  %v687_v46 = vmax.f32 %v577_v30, 0.0  ;;  %v1717_v49 = vadd.f32 %v2586_v26, %v1678_v32  ;;  %v1074_v50 = vadd.f32 %v1042_v43, %v973_v33 }
 0x1a0   : > { %v720_v58 = vmin.f32 %v688_v37, 6.0  ;;  %v1244_v52 = vmul.f32 %v2519_v4, %v2656_v56  ;;  %v1344_v60 = vmul.f32 %v2529_v7, %v2660_v61  ;;  %v1174_v5 = vadd.f32 %v1142_v29, %v1073_v35 }
 0x1a1   : > { %v1718_v59 = vadd.f32 %v2586_v26, %v1679_v34  ;;  %v719_v1 = vmin.f32 %v687_v46, 6.0  ;;  %v1749_v2 = vmax.f32 %v1717_v49, 0.0  ;;  %v1175_v9 = vadd.f32 %v1143_v57, %v1074_v50 }
 0x1a2   : > { %809 = vst.msk [vmem:[#allocation2 + $0xb1] sm:$0xff] %vm739_vm1, %v720_v58  ;;  %v1345_v15 = vmul.f32 %v2529_v7, %v2662_v62  ;;  %v1446_v16 = vmul.f32 %v2560_v47, %v2701_v51  ;;  %v1447_v18 = vmul.f32 %v2560_v47, %v2703_v54  ;;  %v1275_v22 = vadd.f32 %v1243_v45, %v1174_v5 }
 0x1a3   : > { %v1750_v14 = vmax.f32 %v1718_v59, 0.0  ;;  %808 = vst.msk [vmem:[#allocation2 + $0xa9] sm:$0xff] %vm739_vm1, %v719_v1  ;;  %v2226_v3 = vpop.f32.mrb[14].mxu0  ;;  %v2726_v21 = vmin.f32 %v1749_v2, 6.0  ;;  %v1276_v23 = vadd.f32 %v1244_v52, %v1175_v9  ;;  %v1547_v24 = vmul.f32 %v2549_v39, %v2710_v63 }
 0x1a4   : > { %v592_v25 = vadd.f32 %v2226_v3, %v2487_v36  ;;  %v586_v27 = vpop.f32.mrb[15].mxu0  ;;  %v1548_v38 = vmul.f32 %v2549_v39, %v2712_v10  ;;  %v1648_v43 = vmul.f32 %v2554_v41, %v2714_v13  ;;  %v1376_v30 = vadd.f32 %v1344_v60, %v1275_v22 }
 0x1a5   : > { %v2731_v28 = vmin.f32 %v1750_v14, 6.0  ;;  %v587_v29 = vadd.f32 %v2487_v36, %v586_v27  ;;  %v1377_v32 = vadd.f32 %v1345_v15, %v1276_v23  ;;  %v1649_v44 = vmul.f32 %v2554_v41, %v2723_v20 }
 0x1a6   : > { %v690_v33 = vmax.f32 %v592_v25, 0.0  ;;  %v873_v34 = vmul.f32 %v2493_v40, %v2637_v53  ;;  %v874_v57 = vmul.f32 %v2493_v40, %v2645_v31  ;;  %v1478_v46 = vadd.f32 %v1446_v16, %v1376_v30  ;;  %v2764_v16 = vld [vmem:[#allocation2 + $0x90] sm:$0xff] }
 0x1a7   : > { %v689_v45 = vmax.f32 %v587_v29, 0.0  ;;  %v1479_v49 = vadd.f32 %v1447_v18, %v1377_v32  ;;  %v942_v35 = vmul.f32 %v2499_v42, %v2651_v48  ;;  %v943_v58 = vmul.f32 %v2499_v42, %v2656_v56  ;;  %3488 = vst [vmem:[#allocation3_spill] sm:$0xff] %v2764_v16  ;;  %v2766_v18 = vld [vmem:[#allocation2 + $0x98] sm:$0xff] }
 0x1a8   : > { %v722_v50 = vmin.f32 %v690_v33, 6.0  ;;  %v1043_v59 = vmul.f32 %v2509_v55, %v2660_v61  ;;  %v1044_v52 = vmul.f32 %v2509_v55, %v2662_v62  ;;  %v1579_v60 = vadd.f32 %v1547_v24, %v1478_v46  ;;  %3489 = vst [vmem:[#allocation4_spill] sm:$0xff] %v2766_v18  ;;  %v2776_v30 = vld [vmem:[#allocation2 + $0x91] sm:$0xff]  ;;  %v2778_v32 = vld [vmem:[#allocation2 + $0x99] sm:$0xff] }
 0x1a9   : > { %v721_v53 = vmin.f32 %v689_v45, 6.0  ;;  %v1580_v1 = vadd.f32 %v1548_v38, %v1479_v49  ;;  %v974_v31 = vadd.f32 %v942_v35, %v873_v34  ;;  %v975_v2 = vadd.f32 %v943_v58, %v874_v57  ;;  %3490 = vst [vmem:[#allocation5_spill] sm:$0xff] %v2776_v30  ;;  %3491 = vst [vmem:[#allocation6_spill] sm:$0xff] %v2778_v32 }
 0x1aa   : > { %811 = vst.msk [vmem:[#allocation2 + $0xc9] sm:$0xff] %vm739_vm1, %v722_v50  ;;  %v1144_v48 = vmul.f32 %v2524_v6, %v2701_v51  ;;  %v1145_v5 = vmul.f32 %v2524_v6, %v2703_v54  ;;  %v1245_v56 = vmul.f32 %v2519_v4, %v2710_v63  ;;  %v1680_v62 = vadd.f32 %v1648_v43, %v1579_v60  ;;  %v2784_v50 = vld [vmem:[#allocation2 + $0x92] sm:$0xff] }
 0x1ab   : > { %810 = vst.msk [vmem:[#allocation2 + $0xc1] sm:$0xff] %vm739_vm1, %v721_v53  ;;  %v2229_v61 = vpop.f32.mrb[16].mxu0  ;;  %v1681_v9 = vadd.f32 %v1649_v44, %v1580_v1  ;;  %v1075_v14 = vadd.f32 %v1043_v59, %v974_v31  ;;  %v1246_v15 = vmul.f32 %v2519_v4, %v2712_v10  ;;  %v1076_v23 = vadd.f32 %v1044_v52, %v975_v2 }
 0x1ac   : > { %v602_v3 = vadd.f32 %v2229_v61, %v2487_v36  ;;  %v596_v22 = vpop.f32.mrb[17].mxu0  ;;  %v1346_v24 = vmul.f32 %v2529_v7, %v2714_v13  ;;  %v1347_v25 = vmul.f32 %v2529_v7, %v2723_v20  ;;  %v1719_v38 = vadd.f32 %v2586_v26, %v1680_v62  ;;  %3492 = vst [vmem:[#allocation7_spill] sm:$0xff] %v2784_v50  ;;  %v2794_v61 = vld [vmem:[#allocation2 + $0x9a] sm:$0xff] }
 0x1ad   : > { %v597_v27 = vadd.f32 %v2487_v36, %v596_v22  ;;  %v1720_v43 = vadd.f32 %v2586_v26, %v1681_v9  ;;  %v1176_v29 = vadd.f32 %v1144_v48, %v1075_v14  ;;  %v1177_v33 = vadd.f32 %v1145_v5, %v1076_v23  ;;  %3493 = vst [vmem:[#allocation8_spill] sm:$0xff] %v2794_v61 }
 0x1ae   : > { %v692_v44 = vmax.f32 %v602_v3, 0.0  ;;  %v1448_v34 = vmul.f32 %v2560_v47, %v2764_v16  ;;  %v1449_v57 = vmul.f32 %v2560_v47, %v2766_v18  ;;  %v1751_v46 = vmax.f32 %v1719_v38, 0.0 }
 0x1af   : > { %v691_v45 = vmax.f32 %v597_v27, 0.0  ;;  %v1752_v49 = vmax.f32 %v1720_v43, 0.0  ;;  %v1277_v35 = vadd.f32 %v1245_v56, %v1176_v29  ;;  %v1278_v59 = vadd.f32 %v1246_v15, %v1177_v33 }
 0x1b0   : > { %v724_v58 = vmin.f32 %v692_v44, 6.0  ;;  %v1549_v52 = vmul.f32 %v2549_v39, %v2776_v30  ;;  %v1550_v53 = vmul.f32 %v2549_v39, %v2778_v32  ;;  %v2790_v2 = vmin.f32 %v1751_v46, 6.0 }
 0x1b1   : > { %v723_v60 = vmin.f32 %v691_v45, 6.0  ;;  %v914_v1 = vld [vmem:[#allocation2 + $0xc9] sm:$0xff]  ;;  %v2792_v48 = vmin.f32 %v1752_v49, 6.0  ;;  %v1378_v5 = vadd.f32 %v1346_v24, %v1277_v35  ;;  %v1379_v3 = vadd.f32 %v1347_v25, %v1278_v59 }
 0x1b2   : > { %v1015_v31 = vld [vmem:[#allocation2 + $0xca] sm:$0xff]  ;;  %813 = vst.msk [vmem:[#allocation2 + $0xe1] sm:$0xff] %vm739_vm1, %v724_v58  ;;  %v844_v56 = vld [vmem:[#allocation2 + $0xc0] sm:$0xff]  ;;  %v951_v14 = vmul.f32 %v2499_v42, %v914_v1  ;;  %v1650_v22 = vmul.f32 %v2554_v41, %v2784_v50  ;;  %v1651_v59 = vmul.f32 %v2554_v41, %v2794_v61 }
 0x1b3   : > { %v845_v62 = vld [vmem:[#allocation2 + $0xc8] sm:$0xff]  ;;  %v1052_v15 = vmul.f32 %v2509_v55, %v1015_v31  ;;  %812 = vst.msk [vmem:[#allocation2 + $0xd9] sm:$0xff] %vm739_vm1, %v723_v60  ;;  %v2232_v23 = vpop.f32.mrb[18].mxu0  ;;  %v881_v24 = vmul.f32 %v2493_v40, %v844_v56  ;;  %v1480_v45 = vadd.f32 %v1448_v34, %v1378_v5  ;;  %v1481_v46 = vadd.f32 %v1449_v57, %v1379_v3 }
 0x1b4   : > { %v913_v9 = vld [vmem:[#allocation2 + $0xc1] sm:$0xff]  ;;  %v882_v27 = vmul.f32 %v2493_v40, %v845_v62  ;;  %v612_v44 = vadd.f32 %v2232_v23, %v2487_v36  ;;  %v606_v33 = vpop.f32.mrb[19].mxu0  ;;  %v2814_v56 = vmul.f32 %v2493_v40, %v2701_v51  ;;  %v2818_v34 = vmul.f32 %v2493_v40, %v2703_v54 }
 0x1b5   : > { %v950_v38 = vmul.f32 %v2499_v42, %v913_v9  ;;  %v1014_v43 = vld [vmem:[#allocation2 + $0xc2] sm:$0xff]  ;;  %v607_v49 = vadd.f32 %v2487_v36, %v606_v33  ;;  %v1581_v1 = vadd.f32 %v1549_v52, %v1480_v45  ;;  %v1582_v31 = vadd.f32 %v1550_v53, %v1481_v46 }
 0x1b6   : > { %v1051_v25 = vmul.f32 %v2509_v55, %v1014_v43  ;;  %v983_v58 = vadd.f32 %v951_v14, %v882_v27  ;;  %v694_v60 = vmax.f32 %v612_v44, 0.0  ;;  %v2822_v3 = vmul.f32 %v2499_v42, %v2710_v63 }
 0x1b7   : > { %v982_v35 = vadd.f32 %v950_v38, %v881_v24  ;;  %v693_v62 = vmax.f32 %v607_v49, 0.0  ;;  %v1682_v5 = vadd.f32 %v1650_v22, %v1581_v1  ;;  %v1683_v14 = vadd.f32 %v1651_v59, %v1582_v31 }
 0x1b8   : > { %v1084_v23 = vadd.f32 %v1052_v15, %v983_v58  ;;  %v726_v57 = vmin.f32 %v694_v60, 6.0  ;;  %v2826_v51 = vmul.f32 %v2499_v42, %v2712_v10  ;;  %v2830_v15 = vmul.f32 %v2509_v55, %v2714_v13 }
 0x1b9   : > { %v1083_v9 = vadd.f32 %v1051_v25, %v982_v35  ;;  %v725_v52 = vmin.f32 %v693_v62, 6.0  ;;  %v1217_v53 = vld [vmem:[#allocation2 + $0xe1] sm:$0xff]  ;;  %v2834_v54 = vmul.f32 %v2509_v55, %v2723_v20 }
 0x1ba   : > { %v1318_v24 = vld [vmem:[#allocation2 + $0xe2] sm:$0xff]  ;;  %3494 = vst [vmem:[#allocation9_spill] sm:$0xff] %v2830_v15  ;;  %815 = vst.msk [vmem:[#allocation2 + $0xf9] sm:$0xff] %vm739_vm1, %v726_v57  ;;  %v1115_v22 = vld [vmem:[#allocation2 + $0xd8] sm:$0xff]  ;;  %v1254_v38 = vmul.f32 %v2519_v4, %v1217_v53  ;;  %v953_v10 = vmul.f32 %v2499_v42, %v1217_v53 }
 0x1bb   : > { %3495 = vst [vmem:[#allocation10_spill] sm:$0xff] %v2834_v54  ;;  %v1116_v63 = vld [vmem:[#allocation2 + $0xe0] sm:$0xff]  ;;  %v1355_v43 = vmul.f32 %v2529_v7, %v1318_v24  ;;  %v1054_v44 = vmul.f32 %v2509_v55, %v1318_v24  ;;  %814 = vst.msk [vmem:[#allocation2 + $0xf1] sm:$0xff] %vm739_vm1, %v725_v52  ;;  %v2235_v13 = vpop.f32.mrb[20].mxu0  ;;  %v1152_v33 = vmul.f32 %v2524_v6, %v1115_v22 }
 0x1bc   : > { %v1216_v27 = vld [vmem:[#allocation2 + $0xd9] sm:$0xff]  ;;  %v1153_v20 = vmul.f32 %v2524_v6, %v1116_v63  ;;  %v883_v46 = vmul.f32 %v2493_v40, %v1115_v22  ;;  %v622_v49 = vadd.f32 %v2235_v13, %v2487_v36  ;;  %v616_v35 = vpop.f32.mrb[21].mxu0  ;;  %v884_v59 = vmul.f32 %v2493_v40, %v1116_v63 }
 0x1bd   : > { %v1253_v25 = vmul.f32 %v2519_v4, %v1216_v27  ;;  %v1317_v45 = vld [vmem:[#allocation2 + $0xda] sm:$0xff]  ;;  %v952_v60 = vmul.f32 %v2499_v42, %v1216_v27  ;;  %v617_v1 = vadd.f32 %v2487_v36, %v616_v35  ;;  %v1184_v31 = vadd.f32 %v1152_v33, %v1083_v9 }
 0x1be   : > { %v1354_v58 = vmul.f32 %v2529_v7, %v1317_v45  ;;  %v1185_v62 = vadd.f32 %v1153_v20, %v1084_v23  ;;  %v1053_v57 = vmul.f32 %v2509_v55, %v1317_v45  ;;  %v1809_v52 = vld [vmem:[%s3473_s5] sm:$0xff]  ;;  %v696_v53 = vmax.f32 %v622_v49, 0.0 }
 0x1bf   : > { %v984_v24 = vadd.f32 %v952_v60, %v883_v46  ;;  %v985_v22 = vadd.f32 %v953_v10, %v884_v59  ;;  %v2856_v13 = vadd.f32 %v2586_v26, %v1682_v5  ;;  %2199 = vmatprep.mubr.msk.f32.mxu1 %vm739_vm1, %v1809_v52  ;;  %v695_v63 = vmax.f32 %v617_v1, 0.0 }
 0x1c0   : > { %v1285_v27 = vadd.f32 %v1253_v25, %v1184_v31  ;;  %v1286_v29 = vadd.f32 %v1254_v38, %v1185_v62  ;;  %v2860_v9 = vadd.f32 %v2586_v26, %v1683_v14  ;;  %v728_v23 = vmin.f32 %v696_v53, 6.0 }
 0x1c1   : > { %v1085_v33 = vadd.f32 %v1053_v57, %v984_v24  ;;  %v1086_v20 = vadd.f32 %v1054_v44, %v985_v22  ;;  %v727_v35 = vmin.f32 %v695_v63, 6.0  ;;  %v1521_v10 = vld [vmem:[#allocation2 + $0xf9] sm:$0xff] }
 0x1c2   : > { %v1386_v49 = vadd.f32 %v1354_v58, %v1285_v27  ;;  %v1387_v46 = vadd.f32 %v1355_v43, %v1286_v29  ;;  %v2863_v59 = vld [vmem:[#allocation2 + $0xfa] sm:$0xff]  ;;  %817 = vst.msk [vmem:[#allocation2 + $0x111] sm:$0xff] %vm739_vm1, %v728_v23  ;;  %v1419_v25 = vld [vmem:[#allocation2 + $0xf0] sm:$0xff]  ;;  %v1558_v14 = vmul.f32 %v2549_v39, %v1521_v10  ;;  %v1256_v1 = vmul.f32 %v2519_v4, %v1521_v10 }
 0x1c3   : > { %v1420_v38 = vld [vmem:[#allocation2 + $0xf8] sm:$0xff]  ;;  %v1659_v44 = vmul.f32 %v2554_v41, %v2863_v59  ;;  %v1357_v29 = vmul.f32 %v2529_v7, %v2863_v59  ;;  %816 = vst.msk [vmem:[#allocation2 + $0x109] sm:$0xff] %vm739_vm1, %v727_v35  ;;  %v2238_v43 = vpop.f32.mrb[22].mxu0  ;;  %v1456_v58 = vmul.f32 %v2560_v47, %v1419_v25  ;;  %v1154_v52 = vmul.f32 %v2524_v6, %v1419_v25 }
 0x1c4   : > { %v1520_v60 = vld [vmem:[#allocation2 + $0xf1] sm:$0xff]  ;;  %v1457_v31 = vmul.f32 %v2560_v47, %v1420_v38  ;;  %v632_v53 = vadd.f32 %v2238_v43, %v2487_v36  ;;  %v626_v24 = vpop.f32.mrb[23].mxu0  ;;  %v1155_v63 = vmul.f32 %v2524_v6, %v1420_v38  ;;  %v885_v61 = vmul.f32 %v2493_v40, %v1419_v25 }
 0x1c5   : > { %v1557_v62 = vmul.f32 %v2549_v39, %v1520_v60  ;;  %v1621_v57 = vld [vmem:[#allocation2 + $0xf2] sm:$0xff]  ;;  %v1255_v27 = vmul.f32 %v2519_v4, %v1520_v60  ;;  %v627_v23 = vadd.f32 %v2487_v36, %v626_v24  ;;  %v1488_v35 = vadd.f32 %v1456_v58, %v1386_v49 }
 0x1c6   : > { %v1658_v22 = vmul.f32 %v2554_v41, %v1621_v57  ;;  %v1489_v5 = vadd.f32 %v1457_v31, %v1387_v46  ;;  %v1186_v45 = vadd.f32 %v1154_v52, %v1085_v33  ;;  %v698_v37 = vmax.f32 %v632_v53, 0.0 }
 0x1c7   : > { %v1187_v17 = vadd.f32 %v1155_v63, %v1086_v20  ;;  %v1356_v19 = vmul.f32 %v2529_v7, %v1621_v57  ;;  %v697_v50 = vmax.f32 %v627_v23, 0.0  ;;  %v1589_v43 = vadd.f32 %v1557_v62, %v1488_v35 }
 0x1c8   : > { %v1590_v32 = vadd.f32 %v1558_v14, %v1489_v5  ;;  %v1287_v30 = vadd.f32 %v1255_v27, %v1186_v45  ;;  %v730_v54 = vmin.f32 %v698_v37, 6.0  ;;  %v886_v18 = vmul.f32 %v2493_v40, %v1420_v38 }
 0x1c9   : > { %v1288_v15 = vadd.f32 %v1256_v1, %v1187_v17  ;;  %v954_v16 = vmul.f32 %v2499_v42, %v1520_v60  ;;  %v729_v24 = vmin.f32 %v697_v50, 6.0  ;;  %v1690_v49 = vadd.f32 %v1658_v22, %v1589_v43  ;;  %v2887_v58 = vld [vmem:[#allocation2 + $0x111] sm:$0xff] }
 0x1ca   : > { %v1691_v46 = vadd.f32 %v1659_v44, %v1590_v32  ;;  %v1388_v33 = vadd.f32 %v1356_v19, %v1287_v30  ;;  %v2889_v20 = vld [vmem:[#allocation2 + $0x112] sm:$0xff]  ;;  %819 = vst.msk [vmem:[#allocation2 + $0x129] sm:$0xff] %vm739_vm1, %v730_v54  ;;  %v2892_v31 = vld [vmem:[#allocation2 + $0x108] sm:$0xff]  ;;  %v1560_v40 = vmul.f32 %v2549_v39, %v2887_v58  ;;  %v955_v19 = vmul.f32 %v2499_v42, %v1521_v10 }
 0x1cb   : > { %v1389_v25 = vadd.f32 %v1357_v29, %v1288_v15  ;;  %v2894_v45 = vld [vmem:[#allocation2 + $0x110] sm:$0xff]  ;;  %v1661_v37 = vmul.f32 %v2554_v41, %v2889_v20  ;;  %818 = vst.msk [vmem:[#allocation2 + $0x121] sm:$0xff] %vm739_vm1, %v729_v24  ;;  %v2241_v30 = vpop.f32.mrb[24].mxu0  ;;  %v1729_v32 = vadd.f32 %v2586_v26, %v1690_v49  ;;  %v1458_v15 = vmul.f32 %v2560_v47, %v2892_v31  ;;  %v2324_v49 = vld [vmem:[%s2391_s29 + $0x8] sm:$0xff] }
 0x1cc   : > { %v2896_v17 = vld [vmem:[#allocation2 + $0x109] sm:$0xff]  ;;  %v1730_v50 = vadd.f32 %v2586_v26, %v1691_v46  ;;  %v1459_v54 = vmul.f32 %v2560_v47, %v2894_v45  ;;  %v642_v38 = vadd.f32 %v2241_v30, %v2487_v36  ;;  %v636_v60 = vpop.f32.mrb[25].mxu0  ;;  %v986_v14 = vadd.f32 %v954_v16, %v885_v61 }
 0x1cd   : > { %v2910_v5 = vld [vmem:[#allocation2 + $0x10a] sm:$0xff]  ;;  %v1559_v42 = vmul.f32 %v2549_v39, %v2896_v17  ;;  %v637_v44 = vadd.f32 %v2487_v36, %v636_v60  ;;  %v1761_v1 = vmax.f32 %v1729_v32, 0.0  ;;  %v1490_v62 = vadd.f32 %v1458_v15, %v1388_v33 }
 0x1ce   : > { %v1660_v10 = vmul.f32 %v2554_v41, %v2910_v5  ;;  %v1762_v29 = vmax.f32 %v1730_v50, 0.0  ;;  %v700_v52 = vmax.f32 %v642_v38, 0.0  ;;  %v1491_v53 = vadd.f32 %v1459_v54, %v1389_v25  ;;  %v2949_v54 = vld [vmem:[%s3470_s2] ss:$0 sm:$0xff] }
 0x1cf   : > { %v987_v22 = vadd.f32 %v955_v19, %v886_v18  ;;  %v1055_v63 = vmul.f32 %v2509_v55, %v1621_v57  ;;  %v699_v27 = vmax.f32 %v637_v44, 0.0  ;;  %v1793_v23 = vmin.f32 %v1761_v1, 6.0 }
 0x1d0   : > { %v1794_v35 = vmin.f32 %v1762_v29, 6.0  ;;  %v1591_v43 = vadd.f32 %v1559_v42, %v1490_v62  ;;  %v732_v24 = vmin.f32 %v700_v52, 6.0  ;;  %v1592_v36 = vadd.f32 %v1560_v40, %v1491_v53 }
 0x1d1   : > { %v1056_v16 = vmul.f32 %v2509_v55, %v2863_v59  ;;  %v1087_v61 = vadd.f32 %v1055_v63, %v986_v14  ;;  %v731_v46 = vmin.f32 %v699_v27, 6.0  ;;  %v1156_v57 = vmul.f32 %v2524_v6, %v2892_v31  ;;  %v2965_v53 = vld [vmem:[#allocation2 + $0x129] sm:$0xff] }
 0x1d2   : > { %v2251_v18 = vpack.c.bf16 %v1794_v35, %v1793_v23  ;;  %v1692_v33 = vadd.f32 %v1660_v10, %v1591_v43  ;;  %821 = vst.msk [vmem:[#allocation2 + $0x141] sm:$0xff] %vm739_vm1, %v732_v24  ;;  %v1693_v25 = vadd.f32 %v1661_v37, %v1592_v36  ;;  %v1157_v30 = vmul.f32 %v2524_v6, %v2894_v45  ;;  %v2934_v32 = vld [vmem:[#allocation2 + $0x120] sm:$0xff]  ;;  %v2944_v15 = vld [vmem:[#allocation2 + $0x128] sm:$0xff] }
 0x1d3   : > { %v1088_v19 = vadd.f32 %v1056_v16, %v987_v22  ;;  %v1257_v40 = vmul.f32 %v2519_v4, %v2896_v17  ;;  %820 = vst.msk [vmem:[#allocation2 + $0x139] sm:$0xff] %vm739_vm1, %v731_v46  ;;  %v2244_v55 = vpop.f32.mrb[26].mxu0  ;;  %v1188_v50 = vadd.f32 %v1156_v57, %v1087_v61  ;;  %v1258_v37 = vmul.f32 %v2519_v4, %v2887_v58  ;;  %v2960_v44 = vld [vmem:[#allocation2 + $0x121] sm:$0xff] }
 0x1d4   : > { %2253 = vmatprep.subr.msk.bf16.mxu1 %vm2921_vm3, %v2251_v18  ;;  %v1731_v59 = vadd.f32 %v2586_v26, %v1692_v33  ;;  %v1358_v6 = vmul.f32 %v2529_v7, %v2910_v5  ;;  %v652_v38 = vadd.f32 %v2949_v54, %v2244_v55  ;;  %v646_v60 = vpop.f32.mrb[27].mxu0  ;;  %v3498_v42 = vpack.c.bf16 %v2624_v12, %v2622_v11  ;;  %v2969_v27 = vld [vmem:[#allocation2 + $0x122] sm:$0xff] }
 0x1d5   : > { %v1732_v4 = vadd.f32 %v2586_v26, %v1693_v25  ;;  %v1189_v10 = vadd.f32 %v1157_v30, %v1088_v19  ;;  %v1359_v14 = vmul.f32 %v2529_v7, %v2889_v20  ;;  %v647_v1 = vadd.f32 %v2949_v54, %v646_v60  ;;  %v2971_v7 = vld [vmem:[#allocation2 + $0x12a] sm:$0xff]  ;;  %v2985_v30 = vld [vmem:[%s3471_s3] ss:$0 sm:$0xff] }
 0x1d6   : > { %2256 = vmatpush3.bf16.xpose.msk.msra.mxu1 %vm2921_vm3, %v3498_v42  ;;  %v1763_v29 = vmax.f32 %v1731_v59, 0.0  ;;  %v1289_v62 = vadd.f32 %v1257_v40, %v1188_v50  ;;  %v1460_v52 = vmul.f32 %v2560_v47, %v2934_v32  ;;  %v702_v11 = vmax.f32 %v652_v38, 0.0 }
 0x1d7   : > { %v1764_v12 = vmax.f32 %v1732_v4, 0.0  ;;  %v1290_v22 = vadd.f32 %v1258_v37, %v1189_v10  ;;  %v1461_v63 = vmul.f32 %v2560_v47, %v2944_v15  ;;  %v701_v23 = vmax.f32 %v647_v1, 0.0 }
 0x1d8   : > { %v1795_v35 = vmin.f32 %v1763_v29, 6.0  ;;  %v1390_v43 = vadd.f32 %v1358_v6, %v1289_v62  ;;  %v1561_v24 = vmul.f32 %v2549_v39, %v2960_v44  ;;  %v734_v36 = vmin.f32 %v702_v11, 6.0 }
 0x1d9   : > { %v1796_v16 = vmin.f32 %v1764_v12, 6.0  ;;  %v1391_v61 = vadd.f32 %v1359_v14, %v1290_v22  ;;  %v1562_v46 = vmul.f32 %v2549_v39, %v2965_v53  ;;  %v733_v18 = vmin.f32 %v701_v23, 6.0 }
 0x1da   : > { %v1492_v33 = vadd.f32 %v1460_v52, %v1390_v43  ;;  %v1662_v47 = vmul.f32 %v2554_v41, %v2969_v27  ;;  %v1663_v57 = vmul.f32 %v2554_v41, %v2971_v7  ;;  %823 = vst.msk [vmem:[#allocation2 + $0x159] sm:$0xff] %vm739_vm1, %v734_v36  ;;  %v887_v39 = vmul.f32 %v2985_v30, %v2892_v31  ;;  %v2995_v41 = vld [vmem:[%s3471_s3 + $0x1] ss:$0 sm:$0xff]  ;;  %v3004_v31 = vld [vmem:[%s3471_s3 + $0x2] ss:$0 sm:$0xff] }
 0x1db   : > { %v2257_v25 = vpack.c.bf16 %v1796_v16, %v1795_v35  ;;  %v1493_v19 = vadd.f32 %v1461_v63, %v1391_v61  ;;  %v888_v40 = vmul.f32 %v2985_v30, %v2894_v45  ;;  %822 = vst.msk [vmem:[#allocation2 + $0x151] sm:$0xff] %vm739_vm1, %v733_v18  ;;  %v2247_v55 = vpop.f32.mrb[28].mxu0  ;;  %v956_v50 = vmul.f32 %v2995_v41, %v2896_v17  ;;  %v3031_v52 = vld [vmem:[%s3471_s3 + $0x4] ss:$0 sm:$0xff]  ;;  %v3036_v63 = vld [vmem:[#allocation2 + $0x138] sm:$0xff] }
 0x1dc   : > { %v1593_v59 = vadd.f32 %v1561_v24, %v1492_v33  ;;  %v957_v37 = vmul.f32 %v2995_v41, %v2887_v58  ;;  %v1057_v45 = vmul.f32 %v3004_v31, %v2910_v5  ;;  %v662_v6 = vadd.f32 %v2949_v54, %v2247_v55  ;;  %v656_v38 = vpop.f32.mrb[29].mxu0  ;;  %v3016_v58 = vld [vmem:[%s3471_s3 + $0x3] ss:$0 sm:$0xff]  ;;  %v3046_v36 = vld [vmem:[%s3471_s3 + $0x5] ss:$0 sm:$0xff]  ;;  %v3050_v61 = vld [vmem:[#allocation2 + $0x139] sm:$0xff] }
 0x1dd   : > { %2259 = vmatprep.subr.msk.bf16.mxu1 %vm2921_vm3, %v2257_v25  ;;  %v1594_v60 = vadd.f32 %v1562_v46, %v1493_v19  ;;  %v1058_v17 = vmul.f32 %v3004_v31, %v2889_v20  ;;  %v1158_v42 = vmul.f32 %v3016_v58, %v2934_v32  ;;  %v657_v5 = vadd.f32 %v2949_v54, %v656_v38  ;;  %v3038_v23 = vld [vmem:[#allocation2 + $0x140] sm:$0xff] }
 0x1de   : > { %v3499_v4 = vpack.c.bf16 %v2668_v8, %v2664_v0  ;;  %v1694_v10 = vadd.f32 %v1662_v47, %v1593_v59  ;;  %v988_v14 = vadd.f32 %v956_v50, %v887_v39  ;;  %v989_v1 = vadd.f32 %v957_v37, %v888_v40  ;;  %v3062_v39 = vld [vmem:[%s3471_s3 + $0x6] ss:$0 sm:$0xff]  ;;  %v3074_v38 = vld [vmem:[%s3471_s3 + $0x7] ss:$0 sm:$0xff] }
 0x1df   : > { %v704_v20 = vmax.f32 %v662_v6, 0.0  ;;  %v1695_v29 = vadd.f32 %v1663_v57, %v1594_v60  ;;  %v1159_v62 = vmul.f32 %v3016_v58, %v2944_v15  ;;  %v1259_v11 = vmul.f32 %v3031_v52, %v2960_v44  ;;  %v3052_v57 = vld [vmem:[#allocation2 + $0x141] sm:$0xff] }
 0x1e0   : > { %2262 = vmatpush3.bf16.xpose.msk.msra.mxu1 %vm2921_vm3, %v3499_v4  ;;  %v703_v0 = vmax.f32 %v657_v5, 0.0  ;;  %v1733_v8 = vadd.f32 %v2586_v26, %v1694_v10  ;;  %v1089_v12 = vadd.f32 %v1057_v45, %v988_v14  ;;  %v1090_v22 = vadd.f32 %v1058_v17, %v989_v1  ;;  %v3068_v59 = vld [vmem:[#allocation2 + $0x142] sm:$0xff] }
 0x1e1   : > { %v736_v35 = vmin.f32 %v704_v20, 6.0  ;;  %v1734_v43 = vadd.f32 %v2586_v26, %v1695_v29  ;;  %v1260_v24 = vmul.f32 %v3031_v52, %v2965_v53  ;;  %v1360_v16 = vmul.f32 %v3046_v36, %v2969_v27  ;;  %v3054_v26 = vld [vmem:[#allocation2 + $0x13a] sm:$0xff]  ;;  %v3084_v10 = vld [vmem:[%s3471_s3 + $0x8] ss:$0 sm:$0xff] }
 0x1e2   : > { %v735_v46 = vmin.f32 %v703_v0, 6.0  ;;  %v1765_v18 = vmax.f32 %v1733_v8, 0.0  ;;  %v1190_v33 = vadd.f32 %v1158_v42, %v1089_v12  ;;  %v1191_v47 = vadd.f32 %v1159_v62, %v1090_v22 }
 0x1e3   : > { %825 = vst.msk [vmem:[#allocation2 + $0x171] sm:$0xff] %vm739_vm1, %v736_v35  ;;  %v1766_v25 = vmax.f32 %v1734_v43, 0.0  ;;  %v1361_v19 = vmul.f32 %v3046_v36, %v2971_v7  ;;  %v1462_v40 = vmul.f32 %v3062_v39, %v3036_v63  ;;  %v1463_v55 = vmul.f32 %v3062_v39, %v3038_v23  ;;  %v2250_v50 = vpop.f32.mrb[30].mxu0 }
 0x1e4   : > { %824 = vst.msk [vmem:[#allocation2 + $0x169] sm:$0xff] %vm739_vm1, %v735_v46  ;;  %v1797_v37 = vmin.f32 %v1765_v18, 6.0  ;;  %v1291_v45 = vadd.f32 %v1259_v11, %v1190_v33  ;;  %v1292_v6 = vadd.f32 %v1260_v24, %v1191_v47  ;;  %v1563_v60 = vmul.f32 %v3074_v38, %v3050_v61  ;;  %v666_v5 = vpop.f32.mrb[31].mxu0 }
 0x1e5   : > { %v672_v17 = vadd.f32 %v2949_v54, %v2250_v50  ;;  %v1798_v42 = vmin.f32 %v1766_v25, 6.0  ;;  %v1564_v4 = vmul.f32 %v3074_v38, %v3052_v57  ;;  %v1664_v14 = vmul.f32 %v3084_v10, %v3054_v26  ;;  %v3110_v25 = vld [vmem:[#allocation2 + $0x150] sm:$0xff] }
 0x1e6   : > { %v667_v1 = vadd.f32 %v2949_v54, %v666_v5  ;;  %v1392_v20 = vadd.f32 %v1360_v16, %v1291_v45  ;;  %v1393_v29 = vadd.f32 %v1361_v19, %v1292_v6  ;;  %v1665_v62 = vmul.f32 %v3084_v10, %v3068_v59  ;;  %v3126_v45 = vld [vmem:[#allocation2 + $0x159] sm:$0xff] }
 0x1e7   : > { %v706_v11 = vmax.f32 %v672_v17, 0.0  ;;  %v2263_v0 = vpack.c.bf16 %v1798_v42, %v1797_v37  ;;  %v889_v8 = vmul.f32 %v2985_v30, %v2934_v32  ;;  %v890_v12 = vmul.f32 %v2985_v30, %v2944_v15  ;;  %v3124_v37 = vld [vmem:[#allocation2 + $0x151] sm:$0xff] }
 0x1e8   : > { %v705_v22 = vmax.f32 %v667_v1, 0.0  ;;  %v1494_v35 = vadd.f32 %v1462_v40, %v1392_v20  ;;  %v1495_v43 = vadd.f32 %v1463_v55, %v1393_v29  ;;  %v958_v24 = vmul.f32 %v2995_v41, %v2960_v44  ;;  %v3128_v6 = vld [vmem:[#allocation2 + $0x152] sm:$0xff] }
 0x1e9   : > { %v738_v54 = vmin.f32 %v706_v11, 6.0  ;;  %2265 = vmatprep.subr.msk.bf16.mxu1 %vm2921_vm3, %v2263_v0  ;;  %v959_v16 = vmul.f32 %v2995_v41, %v2965_v53  ;;  %v1059_v46 = vmul.f32 %v3004_v31, %v2969_v27  ;;  %v1060_v32 = vmul.f32 %v3004_v31, %v2971_v7 }
 0x1ea   : > { %v737_v15 = vmin.f32 %v705_v22, 6.0  ;;  %v3500_v18 = vpack.c.bf16 %v2731_v28, %v2726_v21  ;;  %v1595_v44 = vadd.f32 %v1563_v60, %v1494_v35  ;;  %v1596_v33 = vadd.f32 %v1564_v4, %v1495_v43  ;;  %v3119_v28 = vld [vmem:[#allocation2 + $0x158] sm:$0xff] }
 0x1eb   : > { %v990_v47 = vadd.f32 %v958_v24, %v889_v8  ;;  %827 = vst.msk [vmem:[#allocation2 + $0x189] sm:$0xff] %vm739_vm1, %v738_v54  ;;  %v991_v53 = vadd.f32 %v959_v16, %v890_v12  ;;  %v1160_v27 = vmul.f32 %v3016_v58, %v3036_v63  ;;  %v1161_v7 = vmul.f32 %v3016_v58, %v3038_v23  ;;  %v3136_v4 = vld [vmem:[#allocation2 + $0x15a] sm:$0xff] }
 0x1ec   : > { %2268 = vmatpush3.bf16.xpose.msk.msra.mxu1 %vm2921_vm3, %v3500_v18  ;;  %v1261_v21 = vmul.f32 %v3031_v52, %v3050_v61  ;;  %826 = vst.msk [vmem:[#allocation2 + $0x181] sm:$0xff] %vm739_vm1, %v737_v15  ;;  %v1696_v19 = vadd.f32 %v1664_v14, %v1595_v44  ;;  %v1697_v40 = vadd.f32 %v1665_v62, %v1596_v33  ;;  %v3141_v14 = vld [vmem:[%s3472_s4] ss:$0 sm:$0xff]  ;;  %v3501_v16 = vmax.f32 %v2856_v13, 0.0 }
 0x1ed   : > { %v1091_v55 = vadd.f32 %v1059_v46, %v990_v47  ;;  %v1262_v50 = vmul.f32 %v3031_v52, %v3052_v57  ;;  %v1092_v60 = vadd.f32 %v1060_v32, %v991_v53  ;;  %v1362_v17 = vmul.f32 %v3046_v36, %v3054_v26 }
 0x1ee   : > { %v1363_v42 = vmul.f32 %v3046_v36, %v3068_v59  ;;  %v1464_v5 = vmul.f32 %v3062_v39, %v3110_v25  ;;  %v1735_v1 = vadd.f32 %v3141_v14, %v1696_v19  ;;  %v1736_v20 = vadd.f32 %v3141_v14, %v1697_v40 }
 0x1ef   : > { %v1192_v29 = vadd.f32 %v1160_v27, %v1091_v55  ;;  %v1465_v62 = vmul.f32 %v3062_v39, %v3119_v28  ;;  %v1193_v11 = vadd.f32 %v1161_v7, %v1092_v60  ;;  %v1565_v0 = vmul.f32 %v3074_v38, %v3124_v37 }
 0x1f0   : > { %v1566_v8 = vmul.f32 %v3074_v38, %v3126_v45  ;;  %v1666_v12 = vmul.f32 %v3084_v10, %v3128_v6  ;;  %v1767_v22 = vmax.f32 %v1735_v1, 0.0  ;;  %v1768_v35 = vmax.f32 %v1736_v20, 0.0 }
 0x1f1   : > { %v1293_v43 = vadd.f32 %v1261_v21, %v1192_v29  ;;  %v1667_v24 = vmul.f32 %v3084_v10, %v3136_v4  ;;  %v1294_v54 = vadd.f32 %v1262_v50, %v1193_v11  ;;  %v3157_v46 = vmin.f32 %v3501_v16, 6.0 }
 0x1f2   : > { %v3502_v32 = vmax.f32 %v2860_v9, 0.0  ;;  %v891_v18 = vmul.f32 %v2985_v30, %v3036_v63  ;;  %v1799_v44 = vmin.f32 %v1767_v22, 6.0  ;;  %v1800_v33 = vmin.f32 %v1768_v35, 6.0  ;;  %v3202_v22 = vld [vmem:[#allocation2 + $0x16a] sm:$0xff]  ;;  %v3204_v35 = vld [vmem:[#allocation2 + $0x172] sm:$0xff] }
 0x1f3   : > { %v1394_v47 = vadd.f32 %v1362_v17, %v1293_v43  ;;  %v892_v53 = vmul.f32 %v2985_v30, %v3038_v23  ;;  %v1395_v27 = vadd.f32 %v1363_v42, %v1294_v54  ;;  %v960_v13 = vmul.f32 %v2995_v41, %v3050_v61  ;;  %v3179_v17 = vld [vmem:[#allocation2 + $0x168] sm:$0xff]  ;;  %v3181_v61 = vld [vmem:[#allocation2 + $0x170] sm:$0xff] }
 0x1f4   : > { %v3161_v15 = vmin.f32 %v3502_v32, 6.0  ;;  %v961_v9 = vmul.f32 %v2995_v41, %v3052_v57  ;;  %v2269_v21 = vpack.c.bf16 %v1800_v33, %v1799_v44  ;;  %v1061_v63 = vmul.f32 %v3004_v31, %v3054_v26 }
 0x1f5   : > { %v1496_v19 = vadd.f32 %v1464_v5, %v1394_v47  ;;  %v1062_v40 = vmul.f32 %v3004_v31, %v3068_v59  ;;  %v1497_v55 = vadd.f32 %v1465_v62, %v1395_v27  ;;  %v992_v23 = vadd.f32 %v960_v13, %v891_v18  ;;  %v3191_v5 = vld [vmem:[#allocation2 + $0x169] sm:$0xff] }
 0x1f6   : > { %v2278_v7 = vpack.c.bf16 %v3161_v15, %v3157_v46  ;;  %v993_v50 = vadd.f32 %v961_v9, %v892_v53  ;;  %v1162_v60 = vmul.f32 %v3016_v58, %v3110_v25  ;;  %2271 = vmatprep.subr.msk.bf16.mxu1 %vm2921_vm3, %v2269_v21  ;;  %v1163_v26 = vmul.f32 %v3016_v58, %v3119_v28 }
 0x1f7   : > { %v1597_v57 = vadd.f32 %v1565_v0, %v1496_v19  ;;  %v1263_v59 = vmul.f32 %v3031_v52, %v3124_v37  ;;  %v1264_v42 = vmul.f32 %v3031_v52, %v3126_v45  ;;  %v3503_v1 = vpack.c.bf16 %v2792_v48, %v2790_v2  ;;  %v3200_v0 = vld [vmem:[#allocation2 + $0x171] sm:$0xff] }
 0x1f8   : > { %v1598_v20 = vadd.f32 %v1566_v8, %v1497_v55  ;;  %v1093_v29 = vadd.f32 %v1061_v63, %v992_v23  ;;  %v1094_v62 = vadd.f32 %v1062_v40, %v993_v50  ;;  %v1364_v11 = vmul.f32 %v3046_v36, %v3128_v6  ;;  %v3504_v19 = vld [vmem:[#allocation3_spill] sm:$0xff]  ;;  %v3505_v40 = vld [vmem:[#allocation4_spill] sm:$0xff] }
 0x1f9   : > { %2274 = vmatpush3.bf16.xpose.msk.msra.mxu1 %vm2921_vm3, %v3503_v1  ;;  %v1698_v43 = vadd.f32 %v1666_v12, %v1597_v57  ;;  %v1365_v54 = vmul.f32 %v3046_v36, %v3136_v4  ;;  %v1466_v2 = vmul.f32 %v3062_v39, %v3179_v17  ;;  %v1467_v48 = vmul.f32 %v3062_v39, %v3181_v61  ;;  %v3506_v57 = vld [vmem:[#allocation9_spill] sm:$0xff]  ;;  %v3507_v1 = vld [vmem:[#allocation10_spill] sm:$0xff] }
 0x1fa   : > { %v1699_v8 = vadd.f32 %v1667_v24, %v1598_v20  ;;  %v1194_v16 = vadd.f32 %v1162_v60, %v1093_v29  ;;  %v1195_v32 = vadd.f32 %v1163_v26, %v1094_v62  ;;  %v1567_v18 = vmul.f32 %v3074_v38, %v3191_v5 }
 0x1fb   : > { %v1737_v44 = vadd.f32 %v3141_v14, %v1698_v43  ;;  %v1568_v12 = vmul.f32 %v3074_v38, %v3200_v0  ;;  %v1668_v33 = vmul.f32 %v3084_v10, %v3202_v22  ;;  %v1669_v47 = vmul.f32 %v3084_v10, %v3204_v35 }
 0x1fc   : > { %v1738_v53 = vadd.f32 %v3141_v14, %v1699_v8  ;;  %v1295_v27 = vadd.f32 %v1263_v59, %v1194_v16  ;;  %v1296_v24 = vadd.f32 %v1264_v42, %v1195_v32  ;;  %v976_v13 = vadd.f32 %v2822_v3, %v2814_v56  ;;  %v3231_v59 = vld [vmem:[#allocation2 + $0xa8] sm:$0xff]  ;;  %v3508_v3 = vld [vmem:[#allocation5_spill] sm:$0xff]  ;;  %v3238_v16 = vld [vmem:[#allocation2 + $0xb0] sm:$0xff] }
 0x1fd   : > { %v1769_v9 = vmax.f32 %v1737_v44, 0.0  ;;  %v977_v21 = vadd.f32 %v2826_v51, %v2818_v34  ;;  %v1146_v63 = vmul.f32 %v3016_v58, %v3504_v19  ;;  %v1147_v55 = vmul.f32 %v3016_v58, %v3505_v40  ;;  %v3509_v34 = vld [vmem:[#allocation6_spill] sm:$0xff]  ;;  %v3510_v44 = vld [vmem:[#allocation7_spill] sm:$0xff] }
 0x1fe   : > { %v1770_v23 = vmax.f32 %v1738_v53, 0.0  ;;  %v1396_v50 = vadd.f32 %v1364_v11, %v1295_v27  ;;  %v1397_v60 = vadd.f32 %v1365_v54, %v1296_v24  ;;  %v1077_v26 = vadd.f32 %v3506_v57, %v976_v13  ;;  %v3240_v11 = vld [vmem:[#allocation2 + $0xa9] sm:$0xff]  ;;  %v3242_v54 = vld [vmem:[#allocation2 + $0xb1] sm:$0xff] }
 0x1ff   : > { %v1801_v42 = vmin.f32 %v1769_v9, 6.0  ;;  %v1078_v56 = vadd.f32 %v3507_v1, %v977_v21  ;;  %v1247_v20 = vmul.f32 %v3031_v52, %v3508_v3  ;;  %v1248_v51 = vmul.f32 %v3031_v52, %v3509_v34  ;;  %v3511_v27 = vld [vmem:[#allocation8_spill] sm:$0xff]  ;;  %v3250_v9 = vld [vmem:[#allocation2 + $0xaa] sm:$0xff] }
 0x200   : > { %v1802_v29 = vmin.f32 %v1770_v23, 6.0  ;;  %v1498_v62 = vadd.f32 %v1466_v2, %v1396_v50  ;;  %v1499_v43 = vadd.f32 %v1467_v48, %v1397_v60  ;;  %v1178_v8 = vadd.f32 %v1146_v63, %v1077_v26  ;;  %v3252_v23 = vld [vmem:[#allocation2 + $0xb2] sm:$0xff] }
 0x201   : > { %v1179_v32 = vadd.f32 %v1147_v55, %v1078_v56  ;;  %v1348_v53 = vmul.f32 %v3046_v36, %v3510_v44  ;;  %v1349_v24 = vmul.f32 %v3046_v36, %v3511_v27  ;;  %v1450_v13 = vmul.f32 %v3062_v39, %v3231_v59 }
 0x202   : > { %v2275_v2 = vpack.c.bf16 %v1802_v29, %v1801_v42  ;;  %v1599_v48 = vadd.f32 %v1567_v18, %v1498_v62  ;;  %v1600_v21 = vadd.f32 %v1568_v12, %v1499_v43  ;;  %v1279_v63 = vadd.f32 %v1247_v20, %v1178_v8 }
 0x203   : > { %v1280_v50 = vadd.f32 %v1248_v51, %v1179_v32  ;;  %v1451_v55 = vmul.f32 %v3062_v39, %v3238_v16  ;;  %v1551_v60 = vmul.f32 %v3074_v38, %v3240_v11  ;;  %v1552_v57 = vmul.f32 %v3074_v38, %v3242_v54 }
 0x204   : > { %2277 = vmatprep.subr.msk.bf16.mxu1 %vm2921_vm3, %v2275_v2  ;;  %v1700_v26 = vadd.f32 %v1668_v33, %v1599_v48  ;;  %v1701_v42 = vadd.f32 %v1669_v47, %v1600_v21  ;;  %v1380_v18 = vadd.f32 %v1348_v53, %v1279_v63  ;;  %v1652_v12 = vmul.f32 %v3084_v10, %v3250_v9 }
 0x205   : > { %2280 = vmatpush3.bf16.xpose.msk.msra.mxu1 %vm2921_vm3, %v2278_v7  ;;  %v1381_v1 = vadd.f32 %v1349_v24, %v1280_v50  ;;  %v1653_v56 = vmul.f32 %v3084_v10, %v3252_v23  ;;  %v893_v20 = vmul.f32 %v2985_v30, %v3110_v25  ;;  %v894_v33 = vmul.f32 %v2985_v30, %v3119_v28 }
 0x206   : > { %v1739_v47 = vadd.f32 %v3141_v14, %v1700_v26  ;;  %v1740_v51 = vadd.f32 %v3141_v14, %v1701_v42  ;;  %v1482_v29 = vadd.f32 %v1450_v13, %v1380_v18  ;;  %v962_v46 = vmul.f32 %v2995_v41, %v3124_v37 }
 0x207   : > { %v1483_v15 = vadd.f32 %v1451_v55, %v1381_v1  ;;  %v963_v7 = vmul.f32 %v2995_v41, %v3126_v45  ;;  %v1063_v62 = vmul.f32 %v3004_v31, %v3128_v6  ;;  %v1064_v25 = vmul.f32 %v3004_v31, %v3136_v4  ;;  %v3289_v6 = vld [vmem:[#allocation2 + $0x180] sm:$0xff]  ;;  %v3302_v1 = vld [vmem:[#allocation2 + $0x189] sm:$0xff] }
 0x208   : > { %v1771_v43 = vmax.f32 %v1739_v47, 0.0  ;;  %v1772_v28 = vmax.f32 %v1740_v51, 0.0  ;;  %v1583_v8 = vadd.f32 %v1551_v60, %v1482_v29  ;;  %v994_v32 = vadd.f32 %v962_v46, %v893_v20  ;;  %v3295_v60 = vld [vmem:[#allocation2 + $0x188] sm:$0xff] }
 0x209   : > { %v1584_v53 = vadd.f32 %v1552_v57, %v1483_v15  ;;  %v995_v24 = vadd.f32 %v963_v7, %v894_v33  ;;  %v1164_v13 = vmul.f32 %v3016_v58, %v3179_v17  ;;  %v1165_v37 = vmul.f32 %v3016_v58, %v3181_v61  ;;  %v3297_v57 = vld [vmem:[#allocation2 + $0x181] sm:$0xff]  ;;  %v3311_v29 = vld [vmem:[#allocation2 + $0x18a] sm:$0xff] }
 0x20a   : > { %v1803_v2 = vmin.f32 %v1771_v43, 6.0  ;;  %v1804_v45 = vmin.f32 %v1772_v28, 6.0  ;;  %v1684_v48 = vadd.f32 %v1652_v12, %v1583_v8  ;;  %v1095_v21 = vadd.f32 %v1063_v62, %v994_v32 }
 0x20b   : > { %v1685_v63 = vadd.f32 %v1653_v56, %v1584_v53  ;;  %v1096_v4 = vadd.f32 %v1064_v25, %v995_v24  ;;  %v1265_v50 = vmul.f32 %v3031_v52, %v3191_v5  ;;  %v1266_v55 = vmul.f32 %v3031_v52, %v3200_v0  ;;  %v3304_v56 = vld [vmem:[#allocation2 + $0x182] sm:$0xff] }
 0x20c   : > { %v2281_v26 = vpack.c.bf16 %v1804_v45, %v1803_v2  ;;  %v1723_v42 = vadd.f32 %v3141_v14, %v1684_v48  ;;  %v1196_v18 = vadd.f32 %v1164_v13, %v1095_v21  ;;  %v1366_v12 = vmul.f32 %v3046_v36, %v3202_v22 }
 0x20d   : > { %v1724_v20 = vadd.f32 %v3141_v14, %v1685_v63  ;;  %v1197_v33 = vadd.f32 %v1165_v37, %v1096_v4  ;;  %v1367_v47 = vmul.f32 %v3046_v36, %v3204_v35  ;;  %v1468_v51 = vmul.f32 %v3062_v39, %v3289_v6 }
 0x20e   : > { %2283 = vmatprep.subr.msk.bf16.mxu1 %vm2921_vm3, %v2281_v26  ;;  %v1755_v46 = vmax.f32 %v1723_v42, 0.0  ;;  %v1297_v15 = vadd.f32 %v1265_v50, %v1196_v18  ;;  %v1469_v7 = vmul.f32 %v3062_v39, %v3295_v60  ;;  %v1569_v62 = vmul.f32 %v3074_v38, %v3297_v57 }
 0x20f   : > { %v1756_v25 = vmax.f32 %v1724_v20, 0.0  ;;  %v1298_v43 = vadd.f32 %v1266_v55, %v1197_v33  ;;  %v1570_v28 = vmul.f32 %v3074_v38, %v3302_v1  ;;  %v1670_v8 = vmul.f32 %v3084_v10, %v3304_v56  ;;  %v3347_v20 = vld [vmem:[#allocation2 + $0xc1] sm:$0xff] }
 0x210   : > { %v1787_v32 = vmin.f32 %v1755_v46, 6.0  ;;  %v1398_v53 = vadd.f32 %v1366_v12, %v1297_v15  ;;  %v1671_v24 = vmul.f32 %v3084_v10, %v3311_v29  ;;  %v877_v13 = vmul.f32 %v2985_v30, %v3504_v19  ;;  %v3355_v46 = vld [vmem:[#allocation2 + $0xc9] sm:$0xff] }
 0x211   : > { %v1788_v37 = vmin.f32 %v1756_v25, 6.0  ;;  %v1399_v2 = vadd.f32 %v1367_v47, %v1298_v43  ;;  %v878_v45 = vmul.f32 %v2985_v30, %v3505_v40  ;;  %v946_v48 = vmul.f32 %v2995_v41, %v3508_v3  ;;  %v3339_v40 = vld [vmem:[#allocation2 + $0xc0] sm:$0xff] }
 0x212   : > { %v1500_v21 = vadd.f32 %v1468_v51, %v1398_v53  ;;  %v947_v63 = vmul.f32 %v2995_v41, %v3509_v34  ;;  %v1047_v4 = vmul.f32 %v3004_v31, %v3510_v44  ;;  %v1048_v50 = vmul.f32 %v3004_v31, %v3511_v27  ;;  %v3345_v44 = vld [vmem:[#allocation2 + $0xc8] sm:$0xff] }
 0x213   : > { %v2284_v55 = vpack.c.bf16 %v1788_v37, %v1787_v32  ;;  %v1501_v19 = vadd.f32 %v1469_v7, %v1399_v2  ;;  %v978_v26 = vadd.f32 %v946_v48, %v877_v13  ;;  %v1148_v42 = vmul.f32 %v3016_v58, %v3231_v59  ;;  %v3357_v15 = vld [vmem:[#allocation2 + $0xc2] sm:$0xff] }
 0x214   : > { %v1601_v18 = vadd.f32 %v1569_v62, %v1500_v21  ;;  %v979_v3 = vadd.f32 %v947_v63, %v878_v45  ;;  %v1149_v12 = vmul.f32 %v3016_v58, %v3238_v16  ;;  %v1249_v34 = vmul.f32 %v3031_v52, %v3240_v11 }
 0x215   : > { %2286 = vmatpush3.bf16.xpose.msk.msra.mxu1 %vm2921_vm3, %v2284_v55  ;;  %v1602_v27 = vadd.f32 %v1570_v28, %v1501_v19  ;;  %v1079_v33 = vadd.f32 %v1047_v4, %v978_v26  ;;  %v1250_v47 = vmul.f32 %v3031_v52, %v3242_v54  ;;  %v1350_v51 = vmul.f32 %v3046_v36, %v3250_v9  ;;  %v3363_v28 = vld [vmem:[#allocation2 + $0xca] sm:$0xff] }
 0x216   : > { %v1702_v7 = vadd.f32 %v1670_v8, %v1601_v18  ;;  %v1080_v62 = vadd.f32 %v1048_v50, %v979_v3  ;;  %v1351_v25 = vmul.f32 %v3046_v36, %v3252_v23  ;;  %v1452_v43 = vmul.f32 %v3062_v39, %v3339_v40 }
 0x217   : > { %v1703_v32 = vadd.f32 %v1671_v24, %v1602_v27  ;;  %v1180_v53 = vadd.f32 %v1148_v42, %v1079_v33  ;;  %v1453_v13 = vmul.f32 %v3062_v39, %v3345_v44  ;;  %v1553_v37 = vmul.f32 %v3074_v38, %v3347_v20 }
 0x218   : > { %v1741_v2 = vadd.f32 %v3141_v14, %v1702_v7  ;;  %v1181_v8 = vadd.f32 %v1149_v12, %v1080_v62  ;;  %v1554_v45 = vmul.f32 %v3074_v38, %v3355_v46  ;;  %v1654_v48 = vmul.f32 %v3084_v10, %v3357_v15 }
 0x219   : > { %v1742_v21 = vadd.f32 %v3141_v14, %v1703_v32  ;;  %v1281_v63 = vadd.f32 %v1249_v34, %v1180_v53  ;;  %v1655_v24 = vmul.f32 %v3084_v10, %v3363_v28  ;;  %v895_v4 = vmul.f32 %v2985_v30, %v3179_v17  ;;  %v1433_v32 = vld [vmem:[#allocation2 + $0x198] sm:$0xff] }
 0x21a   : > { %v1773_v50 = vmax.f32 %v1741_v2, 0.0  ;;  %v1282_v55 = vadd.f32 %v1250_v47, %v1181_v8  ;;  %v896_v19 = vmul.f32 %v2985_v30, %v3181_v61  ;;  %v964_v26 = vmul.f32 %v2995_v41, %v3191_v5 }
 0x21b   : > { %v1774_v42 = vmax.f32 %v1742_v21, 0.0  ;;  %v1382_v18 = vadd.f32 %v1350_v51, %v1281_v63  ;;  %v965_v3 = vmul.f32 %v2995_v41, %v3200_v0  ;;  %v1065_v12 = vmul.f32 %v3004_v31, %v3202_v22  ;;  %v1535_v21 = vld [vmem:[#allocation2 + $0x1a1] sm:$0xff] }
 0x21c   : > { %v1805_v34 = vmin.f32 %v1773_v50, 6.0  ;;  %v1383_v27 = vadd.f32 %v1351_v25, %v1282_v55  ;;  %v996_v33 = vadd.f32 %v964_v26, %v895_v4  ;;  %v1066_v17 = vmul.f32 %v3004_v31, %v3204_v35  ;;  %v1434_v25 = vld [vmem:[#allocation2 + $0x1a0] sm:$0xff] }
 0x21d   : > { %v1806_v47 = vmin.f32 %v1774_v42, 6.0  ;;  %v1484_v7 = vadd.f32 %v1452_v43, %v1382_v18  ;;  %v997_v61 = vadd.f32 %v965_v3, %v896_v19  ;;  %v1166_v5 = vmul.f32 %v3016_v58, %v3289_v6  ;;  %v1534_v43 = vld [vmem:[#allocation2 + $0x199] sm:$0xff] }
 0x21e   : > { %v1485_v62 = vadd.f32 %v1453_v13, %v1383_v27  ;;  %v1097_v51 = vadd.f32 %v1065_v12, %v996_v33  ;;  %v1167_v0 = vmul.f32 %v3016_v58, %v3295_v60  ;;  %v1267_v22 = vmul.f32 %v3031_v52, %v3297_v57  ;;  %v1635_v4 = vld [vmem:[#allocation2 + $0x19a] sm:$0xff]  ;;  %v1636_v57 = vld [vmem:[#allocation2 + $0x1a2] sm:$0xff] }
 0x21f   : > { %v2287_v53 = vpack.c.bf16 %v1806_v47, %v1805_v34  ;;  %v1585_v2 = vadd.f32 %v1553_v37, %v1484_v7  ;;  %v1098_v8 = vadd.f32 %v1066_v17, %v997_v61  ;;  %v1268_v35 = vmul.f32 %v3031_v52, %v3302_v1 }
 0x220   : > { %v1586_v63 = vadd.f32 %v1554_v45, %v1485_v62  ;;  %v1198_v6 = vadd.f32 %v1166_v5, %v1097_v51  ;;  %v1368_v13 = vmul.f32 %v3046_v36, %v3304_v56  ;;  %v1369_v60 = vmul.f32 %v3046_v36, %v3311_v29 }
 0x221   : > { %2289 = vmatprep.subr.msk.bf16.mxu1 %vm2921_vm3, %v2287_v53  ;;  %v1686_v37 = vadd.f32 %v1654_v48, %v1585_v2  ;;  %v1199_v50 = vadd.f32 %v1167_v0, %v1098_v8  ;;  %v1470_v55 = vmul.f32 %v3062_v39, %v1433_v32  ;;  %v1471_v1 = vmul.f32 %v3062_v39, %v1434_v25  ;;  %v1417_v53 = vld [vmem:[#allocation2 + $0xd8] sm:$0xff] }
 0x222   : > { %v1687_v19 = vadd.f32 %v1655_v24, %v1586_v63  ;;  %v1299_v45 = vadd.f32 %v1267_v22, %v1198_v6  ;;  %v1571_v26 = vmul.f32 %v3074_v38, %v1534_v43  ;;  %v1572_v56 = vmul.f32 %v3074_v38, %v1535_v21 }
 0x223   : > { %v1725_v42 = vadd.f32 %v3141_v14, %v1686_v37  ;;  %v1300_v29 = vadd.f32 %v1268_v35, %v1199_v50  ;;  %v1672_v18 = vmul.f32 %v3084_v10, %v1635_v4  ;;  %v1673_v3 = vmul.f32 %v3084_v10, %v1636_v57  ;;  %v1519_v57 = vld [vmem:[#allocation2 + $0xe1] sm:$0xff] }
 0x224   : > { %v1726_v48 = vadd.f32 %v3141_v14, %v1687_v19  ;;  %v1400_v12 = vadd.f32 %v1368_v13, %v1299_v45  ;;  %v879_v34 = vmul.f32 %v2985_v30, %v3231_v59  ;;  %v880_v24 = vmul.f32 %v2985_v30, %v3238_v16  ;;  %v1620_v19 = vld [vmem:[#allocation2 + $0xe2] sm:$0xff] }
 0x225   : > { %v1757_v27 = vmax.f32 %v1725_v42, 0.0  ;;  %v1401_v33 = vadd.f32 %v1369_v60, %v1300_v29  ;;  %v948_v17 = vmul.f32 %v2995_v41, %v3240_v11  ;;  %v949_v47 = vmul.f32 %v2995_v41, %v3242_v54 }
 0x226   : > { %v1758_v7 = vmax.f32 %v1726_v48, 0.0  ;;  %v1502_v61 = vadd.f32 %v1470_v55, %v1400_v12  ;;  %v1049_v5 = vmul.f32 %v3004_v31, %v3250_v9  ;;  %v1050_v62 = vmul.f32 %v3004_v31, %v3252_v23  ;;  %v1418_v23 = vld [vmem:[#allocation2 + $0xe0] sm:$0xff] }
 0x227   : > { %v1789_v59 = vmin.f32 %v1757_v27, 6.0  ;;  %v1503_v51 = vadd.f32 %v1471_v1, %v1401_v33  ;;  %v980_v0 = vadd.f32 %v948_v17, %v879_v34  ;;  %v981_v30 = vadd.f32 %v949_v47, %v880_v24  ;;  %v1619_v55 = vld [vmem:[#allocation2 + $0xda] sm:$0xff] }
 0x228   : > { %v1790_v16 = vmin.f32 %v1758_v7, 6.0  ;;  %v1603_v22 = vadd.f32 %v1571_v26, %v1502_v61  ;;  %v1150_v11 = vmul.f32 %v3016_v58, %v3339_v40  ;;  %v1151_v41 = vmul.f32 %v3016_v58, %v3345_v44 }
 0x229   : > { %v1604_v54 = vadd.f32 %v1572_v56, %v1503_v51  ;;  %v1081_v32 = vadd.f32 %v1049_v5, %v980_v0  ;;  %v1082_v25 = vadd.f32 %v1050_v62, %v981_v30  ;;  %v1251_v31 = vmul.f32 %v3031_v52, %v3347_v20  ;;  %v2323_v51 = vld [vmem:[%s2391_s29] sm:$0xff] }
 0x22a   : > { %v2290_v9 = vpack.c.bf16 %v1790_v16, %v1789_v59  ;;  %v1704_v2 = vadd.f32 %v1672_v18, %v1603_v22  ;;  %v1252_v21 = vmul.f32 %v3031_v52, %v3355_v46  ;;  %v1352_v40 = vmul.f32 %v3046_v36, %v3357_v15  ;;  %v1518_v52 = vld [vmem:[#allocation2 + $0xd9] sm:$0xff] }
 0x22b   : > { %v1705_v8 = vadd.f32 %v1673_v3, %v1604_v54  ;;  %v1182_v35 = vadd.f32 %v1150_v11, %v1081_v32  ;;  %v1183_v43 = vadd.f32 %v1151_v41, %v1082_v25  ;;  %v1353_v44 = vmul.f32 %v3046_v36, %v3363_v28  ;;  %v1810_v46 = vld [vmem:[%s3474_s6] sm:$0xff] }
 0x22c   : > { %2292 = vmatpush3.bf16.xpose.msk.msra.mxu1 %vm2921_vm3, %v2290_v9  ;;  %v1743_v58 = vadd.f32 %v3141_v14, %v1704_v2  ;;  %v1454_v20 = vmul.f32 %v3062_v39, %v1417_v53  ;;  %v1455_v60 = vmul.f32 %v3062_v39, %v1418_v23  ;;  %v2334_v36 = vmov 0  }
 0x22d   : > { %v1744_v63 = vadd.f32 %v3141_v14, %v1705_v8  ;;  %v1283_v6 = vadd.f32 %v1251_v31, %v1182_v35  ;;  %v1284_v13 = vadd.f32 %v1252_v21, %v1183_v43  ;;  %2309 = vset.pattern.permute.xlu1 %v2334_v36  ;;  %2310 = vset.pattern.permute.xlu0 %v2334_v36 }
 0x22e   : > { %v1775_v4 = vmax.f32 %v1743_v58, 0.0  ;;  %v1555_v1 = vmul.f32 %v3074_v38, %v1518_v52  ;;  %1813 = vperm.xlu1 %2309, %v1810_v46   ;;  %v1556_v56 = vmul.f32 %v3074_v38, %v1519_v57  ;;  %v1656_v42 = vmul.f32 %v3084_v10, %v1619_v55 }
 0x22f   : > { %v1776_v37 = vmax.f32 %v1744_v63, 0.0  ;;  %v1384_v15 = vadd.f32 %v1352_v40, %v1283_v6  ;;  %v1385_v50 = vadd.f32 %v1353_v44, %v1284_v13  ;;  %v1657_v48 = vmul.f32 %v3084_v10, %v1620_v19  ;;  %v2322_v10 = vld [vmem:[%s3473_s5] sm:$0xff] }
 0x230   : > { %v1807_v28 = vmin.f32 %v1775_v4, 6.0 }
 0x231   : > { %v1808_v39 = vmin.f32 %v1776_v37, 6.0  ;;  %v1486_v45 = vadd.f32 %v1454_v20, %v1384_v15  ;;  %v1487_v26 = vadd.f32 %v1455_v60, %v1385_v50 }
 0x233   : > { %v2293_v29 = vpack.c.bf16 %v1808_v39, %v1807_v28  ;;  %v1587_v18 = vadd.f32 %v1555_v1, %v1486_v45  ;;  %v1588_v3 = vadd.f32 %v1556_v56, %v1487_v26 }
 0x235   : > { %2295 = vmatprep.subr.msk.bf16.mxu1 %vm2921_vm3, %v2293_v29  ;;  %v1688_v12 = vadd.f32 %v1656_v42, %v1587_v18  ;;  %v1689_v34 = vadd.f32 %v1657_v48, %v1588_v3 }
 0x237   : > { %v1727_v24 = vadd.f32 %v3141_v14, %v1688_v12  ;;  %v1728_v27 = vadd.f32 %v3141_v14, %v1689_v34 }
 0x239   : > { %v1759_v33 = vmax.f32 %v1727_v24, 0.0  ;;  %v1760_v38 = vmax.f32 %v1728_v27, 0.0 }
 0x23b   : > { %v1791_v17 = vmin.f32 %v1759_v33, 6.0  ;;  %v1792_v47 = vmin.f32 %v1760_v38, 6.0 }
 0x23d   : > { %v2296_v7 = vpack.c.bf16 %v1792_v47, %v1791_v17 }
 0x23f   : > { %2298 = vmatpush3.bf16.xpose.msk.msra.mxu1 %vm2921_vm3, %v2296_v7 }
 0x246   : > { %2200 = vmatmul.mubr.msk.f32.vlgmr.msra.gmra.mrb[0].mxu1 %vm739_vm1, %v2322_v10 }
 0x2ad   : > { %v1814_v61 = vpop.permute.xlu1 %1813 }
 0x319   : > { %v1981_v5 = vpop.f32.mrb[0].mxu1 }
 0x31a   : > { %v1982_v62 = vadd.f32 %v1981_v5, %v1814_v61  ;;  %v1983_v59 = vpop.f32.mrb[1].mxu1 }
 0x31b   : > { %v1984_v14 = vadd.f32 %v1983_v59, %v1814_v61 }
 0x31c   : > { %v1986_v0 = vadd.f32 %v2323_v51, %v1982_v62 }
 0x31d   : > { %v1987_v30 = vadd.f32 %v2324_v49, %v1984_v14 }
 0x31e   : > { %1988 = vst [vmem:[%s278_s23] sm:$0xff] %v1986_v0 }
 0x31f   : > { %1989 = vst [vmem:[%s278_s23 + $0x8] sm:$0xff] %v1987_v30 }
 0x320 PF: > { %s17_s24 = sadd.s32 1, %s2331_s24  }
 0x321   : > { %p14_p4 = scmp.ge.s32.totalorder %s17_s24, 4  }
 0x323   :  { %16 = sbr.rel (!%p14_p4) target bundleno = 1 (0x1), region = 80 }

</bundles_post_ra>
